<compile_context>
chip_gen: v6e
topology: v6e:2x2x1
jax: 0.10.0
libtpu: 0.0.40
codegen_flags: <defaults>
</compile_context>

<pallas_src>
import functools

import jax
import jax.numpy as jnp
from jax.experimental import pallas as pl
from jax.experimental.pallas import tpu as pltpu


# ----------------------------------------------------------------------------- utils
def _round_up(x, m):
    return (x + m - 1) // m * m


def _linear_params(key, fan_in, fan_out):
    """nn.Linear default init: U(-1/sqrt(fan_in), 1/sqrt(fan_in)); W is (out, in)."""
    kw, kb = jax.random.split(key)
    bound = 1.0 / (fan_in ** 0.5)
    W = jax.random.uniform(kw, (fan_out, fan_in), jnp.float32, -bound, bound)
    b = jax.random.uniform(kb, (fan_out,), jnp.float32, -bound, bound)
    return W, b


def _layer_norm(x, w, b, eps=1e-5):
    mu = jnp.mean(x, axis=-1, keepdims=True)
    var = jnp.var(x, axis=-1, keepdims=True)
    return (x - mu) / jnp.sqrt(var + eps) * w + b


# --------------------------------------------------------------- fused MLP Pallas kernel
def _fused_mlp_kernel(*refs, n_layers, act_on_last):
    """refs = (x_ref, w0, b0, w1, b1, ..., o_ref).

    Computes y = Linear_{L-1}(SiLU(... SiLU(Linear_0(x)) ...)) for one batch tile,
    keeping every intermediate activation in VMEM/vregs. Weights are bf16
    (K, N_pad), biases f32 (1, N_pad); accumulation is f32 on the MXU.
    `act_on_last=True` is used when the MLP is split across several pallas_calls.
    """
    x_ref = refs[0]
    o_ref = refs[-1]
    wb = refs[1:-1]

    h = x_ref[...].astype(jnp.bfloat16)                   # in-kernel cast (VPU filler)
    for i in range(n_layers):
        w = wb[2 * i][...]                                # (K, N_pad) bf16
        b = wb[2 * i + 1][...]                            # (1, N_pad) f32
        y = jnp.dot(h, w, preferred_element_type=jnp.float32) + b
        if i < n_layers - 1 or act_on_last:
            # SiLU via ONE tanh (EUP) instead of exp+reciprocal:
            #   x*sigmoid(x) == x * 0.5 * (tanh(x/2) + 1)
            y = y * (0.5 * (jnp.tanh(0.5 * y) + 1.0))
        if i < n_layers - 1:
            h = y.astype(jnp.bfloat16)
        else:
            o_ref[...] = y.astype(o_ref.dtype)


def _vmem_budget():
    """~0.75x of the chip's VMEM capacity (v5e/v6e: ~96 MiB, v7x: ~48 MiB)."""
    cap = None
    try:
        cap = int(pltpu.get_tpu_info().vmem_capacity_bytes)
    except Exception:
        cap = None
    if not cap or cap <= 0:
        cap = 64 << 20      # conservative fallback = v7x per-core capacity
    return int(cap * 0.75)


def _estimate_vmem(tm, k_in, x_itemsize, weights, biases, n_out_pad, out_itemsize,
                   w_buffers):
    """Actual buffer accounting: streamed tiles (2x), resident weights, f32 intermediates."""
    w_bytes = sum(int(w.size) * w.dtype.itemsize for w in weights) * w_buffers
    b_bytes = sum(int(b.size) * b.dtype.itemsize for b in biases) * w_buffers
    x_bytes = 2 * tm * k_in * x_itemsize                  # double-buffered input tile
    o_bytes = 2 * tm * n_out_pad * out_itemsize           # double-buffered output tile
    max_n = max(w.shape[1] for w in weights)
    inter = 2 * tm * max_n * 4                            # f32 working intermediates
    return w_bytes + b_bytes + x_bytes + o_bytes + inter


def _plan_groups(weights, biases, budget):
    """Greedily split layers so each group's resident weights fit in ~half the budget."""
    limit = budget * 0.5
    groups, cur, cur_bytes = [], [], 0
    for w, b in zip(weights, biases):
        nb = int(w.size) * w.dtype.itemsize + int(b.size) * b.dtype.itemsize
        if cur and cur_bytes + nb > limit:
            groups.append(cur)
            cur, cur_bytes = [], 0
        cur.append((w, b))
        cur_bytes += nb
    if cur:
        groups.append(cur)
    return groups


def _call_group(x, weights, biases, *, act_on_last, out_dtype, tm_target, budget,
                single_buffer_weights):
    M, k_in = x.shape
    assert weights[0].shape[0] == k_in
    n_layers = len(weights)
    n_out_pad = weights[-1].shape[1]
    out_itemsize = jnp.dtype(out_dtype).itemsize
    x_itemsize = jnp.dtype(x.dtype).itemsize
    w_buffers = 1 if single_buffer_weights else 2

    # Waste-aware batch tile; at least 2 grid steps when M spans more than one sublane
    # tile so the "parallel" axis can be sharded across v7x's two TensorCores.
    nt = max(pl.cdiv(M, tm_target), 2 if M > 8 else 1)
    tm = _round_up(pl.cdiv(M, nt), 8)
    while True:
        need = _estimate_vmem(tm, k_in, x_itemsize, weights, biases, n_out_pad,
                              out_itemsize, w_buffers)
        if need <= budget or tm <= 8:
            break
        tm = _round_up(max(tm // 2, 8), 8)
    need = _estimate_vmem(tm, k_in, x_itemsize, weights, biases, n_out_pad,
                          out_itemsize, w_buffers)
    vmem_limit = int(min(max(need + (4 << 20), 16 << 20), budget))

    m_pad = _round_up(M, tm)
    if m_pad != M:
        x = jnp.pad(x, ((0, m_pad - M), (0, 0)))          # pad only the batch axis

    def _const_spec(shape):
        # Grid-invariant block: single-buffer it to halve resident VMEM.
        if single_buffer_weights:
            return pl.BlockSpec(shape, lambda i: (0, 0), pipeline_mode=pl.Buffered(1))
        return pl.BlockSpec(shape, lambda i: (0, 0))

    in_specs = [pl.BlockSpec((tm, k_in), lambda i: (i, 0))]
    operands = [x]
    for w, b in zip(weights, biases):
        in_specs.append(_const_spec(w.shape))
        in_specs.append(_const_spec(b.shape))
        operands.extend([w, b])

    flops = 2 * m_pad * sum(int(w.shape[0]) * int(w.shape[1]) for w in weights)
    trans = m_pad * sum(int(w.shape[1]) for i, w in enumerate(weights)
                        if i < n_layers - 1 or act_on_last)
    bytes_accessed = (m_pad * k_in * x_itemsize + m_pad * n_out_pad * out_itemsize
                      + sum(int(w.size) * w.dtype.itemsize for w in weights)
                      + sum(int(b.size) * b.dtype.itemsize for b in biases))

    return pl.pallas_call(
        functools.partial(_fused_mlp_kernel, n_layers=n_layers, act_on_last=act_on_last),
        out_shape=jax.ShapeDtypeStruct((m_pad, n_out_pad), out_dtype),
        grid=(m_pad // tm,),
        in_specs=in_specs,
        out_specs=pl.BlockSpec((tm, n_out_pad), lambda i: (i, 0)),
        compiler_params=pltpu.CompilerParams(
            dimension_semantics=("parallel",),
            vmem_limit_bytes=vmem_limit),
        cost_estimate=pl.CostEstimate(flops=flops, transcendentals=trans,
                                      bytes_accessed=bytes_accessed),
    )(*operands)


def fused_mlp(x, weights, biases, dim_out, *, tm_target=512):
    """x: (M, K0) f32 (K0 unpadded).  weights[i]: (K_i, N_i_pad) bf16 (pre-transposed,
    zero-padded on N; K padded except for the first layer).  biases[i]: (1, N_i_pad) f32.
    Returns (M, dim_out) f32."""
    M = x.shape[0]
    budget = _vmem_budget()
    groups = _plan_groups(weights, biases, budget)
    # TODO(synk): a single layer whose weights alone exceed the VMEM budget would need
    # K/N tiling with an accumulator grid axis; not needed at TabTransformer MLP widths.
    h = x
    for gi, group in enumerate(groups):
        ws = [w for w, _ in group]
        bs = [b for _, b in group]
        last = gi == len(groups) - 1
        kwargs = dict(act_on_last=not last,
                      out_dtype=jnp.float32 if last else jnp.bfloat16,
                      tm_target=tm_target, budget=budget)
        try:
            h = jax.block_until_ready(
                _call_group(h, ws, bs, single_buffer_weights=True, **kwargs))
        except Exception:
            # Older jax without pipeline_mode / Buffered(1): fall back to default buffering.
            h = jax.block_until_ready(
                _call_group(h, ws, bs, single_buffer_weights=False, **kwargs))
    return h[:M, :dim_out]


class PallasMLP:
    """JAX/Pallas equivalent of the PyTorch MLP(dims, act=nn.SiLU())."""

    def __init__(self, dims, key, compute_dtype=jnp.bfloat16):
        self.dims = list(dims)
        self.params = []       # fp32 (W (out,in), b (out,)) — reference semantics
        self.kernel_w = []     # (K, N_pad) bf16, pre-transposed, lane-padded
        self.kernel_b = []     # (1, N_pad) f32, lane-padded
        for i in range(len(dims) - 1):
            fan_in, fan_out = dims[i], dims[i + 1]
            key, kl = jax.random.split(key)
            W, b = _linear_params(kl, fan_in, fan_out)
            self.params.append((W, b))
            # First layer consumes the raw (unpadded-K) activation straight from HBM;
            # later layers consume the previous layer's lane-padded output.
            k_dim = fan_in if i == 0 else _round_up(fan_in, 128)
            n_pad = _round_up(fan_out, 128)
            w_t = jnp.zeros((k_dim, n_pad), compute_dtype)
            w_t = w_t.at[:fan_in, :fan_out].set(W.T.astype(compute_dtype))
            b_p = jnp.zeros((1, n_pad), jnp.float32).at[0, :fan_out].set(b)
            self.kernel_w.append(w_t)
            self.kernel_b.append(b_p)

    def __call__(self, x):
        return fused_mlp(x, self.kernel_w, self.kernel_b, self.dims[-1])


def mlp_reference(x, params):
    n = len(params)
    for i, (W, b) in enumerate(params):
        x = x @ W.T + b
        if i < n - 1:
            x = x * jax.nn.sigmoid(x)
    return x


# --------------------------------------------------------------------- TabTransformer
class TabTransformer:
    def __init__(self, *, categories, num_continuous, dim, key, depth=6, heads=8,
                 dim_head=16, dim_out=1, mlp_hidden_mults=(4, 2),
                 num_high_card_categories=0, use_shared_categ_embed=True,
                 shared_categ_dim_divisor=8):
        assert all(c > 0 for c in categories)
        self.num_categories = len(categories)
        self.num_continuous = num_continuous
        self.num_high_card_categories = num_high_card_categories
        self.num_unique_categories = sum(categories)
        self.dim = dim
        self.heads = heads
        self.use_shared_categ_embed = use_shared_categ_embed

        shared_dim = dim // shared_categ_dim_divisor if use_shared_categ_embed else 0
        total_tokens = self.num_unique_categories + 1

        key, k_emb, k_shared = jax.random.split(key, 3)
        self.category_embed = jax.random.normal(
            k_emb, (total_tokens, dim - shared_dim), jnp.float32)
        if use_shared_categ_embed:
            self.shared_category_embed = 0.02 * jax.random.normal(
                k_shared, (self.num_categories, shared_dim), jnp.float32)

        self.categories_offset = jnp.cumsum(
            jnp.asarray((1,) + tuple(categories), jnp.int32))[:-1]

        dim_ff = dim * dim_head
        self.layers = []
        for _ in range(depth):
            key, k1, k2, k3, k4 = jax.random.split(key, 5)
            wq, bq = _linear_params(k1, dim, 3 * dim)       # MHA in_proj
            wo, bo = _linear_params(k2, dim, dim)           # MHA out_proj
            w1, b1 = _linear_params(k3, dim, dim_ff)        # FFN linear1
            w2, b2 = _linear_params(k4, dim_ff, dim)        # FFN linear2
            self.layers.append(dict(
                in_proj_w=wq, in_proj_b=bq, out_proj_w=wo, out_proj_b=bo,
                ffn1_w=w1, ffn1_b=b1, ffn2_w=w2, ffn2_b=b2,
                norm1_w=jnp.ones((dim,)), norm1_b=jnp.zeros((dim,)),
                norm2_w=jnp.ones((dim,)), norm2_b=jnp.zeros((dim,))))

        self.cont_norm_w = jnp.ones((num_continuous,), jnp.float32)
        self.cont_norm_b = jnp.zeros((num_continuous,), jnp.float32)

        # TODO(synk): the reference sizes the MLP input as dim*num_categories only, which is
        # shape-inconsistent with the concat of continuous features; include num_continuous
        # (canonical TabTransformer) so the forward pass is runnable.
        input_size = dim * (self.num_categories + num_high_card_categories) + num_continuous
        hidden = [input_size * t for t in mlp_hidden_mults]
        key, k_mlp = jax.random.split(key)
        self.mlp = PallasMLP([input_size, *hidden, dim_out], k_mlp)

    def _encoder_layer(self, src, p):
        S, N, E = src.shape
        H = self.heads
        hd = E // H
        qkv = src @ p['in_proj_w'].T + p['in_proj_b']               # (S, N, 3E)
        q, k, v = jnp.split(qkv, 3, axis=-1)
        q = q.reshape(S, N, H, hd)
        k = k.reshape(S, N, H, hd)
        v = v.reshape(S, N, H, hd)
        scores = jnp.einsum('snhd,tnhd->nhst', q, k) / (hd ** 0.5)
        attn = jax.nn.softmax(scores, axis=-1)                      # dropout: identity (eval)
        ctx = jnp.einsum('nhst,tnhd->snhd', attn, v).reshape(S, N, E)
        attn_out = ctx @ p['out_proj_w'].T + p['out_proj_b']
        x = _layer_norm(src + attn_out, p['norm1_w'], p['norm1_b'])
        ff = jax.nn.relu(x @ p['ffn1_w'].T + p['ffn1_b']) @ p['ffn2_w'].T + p['ffn2_b']
        return _layer_norm(x + ff, p['norm2_w'], p['norm2_b'])

    def __call__(self, x_categ, x_cont, x_high_card_categ=None):
        # TODO(synk): handle_missing_data (string sentinel comparison) and the LM/HuggingFace
        # embedding path need string inputs + an external model; skipped on device.
        assert x_categ.shape[1] == self.num_categories
        assert x_cont.shape[1] == self.num_continuous
        x_categ = x_categ + self.categories_offset
        categ_embed = jnp.take(self.category_embed, x_categ, axis=0)   # (B, C, dim-shared)
        if self.use_shared_categ_embed:
            shared = jnp.broadcast_to(
                self.shared_category_embed[None],
                (categ_embed.shape[0],) + self.shared_category_embed.shape)
            categ_embed = jnp.concatenate([categ_embed, shared], axis=-1)
        # Faithful to the reference: (batch, tokens, dim) is fed straight into a
        # batch_first=False TransformerEncoder, i.e. axis 0 plays the "sequence" role.
        x = categ_embed
        for p in self.layers:
            x = self._encoder_layer(x, p)
        flat_categ = x.reshape(x.shape[0], -1)
        if self.num_continuous > 0:
            normed_cont = _layer_norm(x_cont, self.cont_norm_w, self.cont_norm_b)
            h = jnp.concatenate([flat_categ, normed_cont], axis=1)
        else:
            h = flat_categ
        return self.mlp(h)


# ----------------------------------------------------------------------------- main
if __name__ == "__main__":
    key = jax.random.PRNGKey(0)

    # --- standalone check of the fused Pallas MLP kernel against an fp32 reference ---
    key, kx, kp = jax.random.split(key, 3)
    dims = [128, 512, 256, 1]
    batch = 8
    x = jax.random.normal(kx, (batch, dims[0]), jnp.float32)
    mlp = PallasMLP(dims, kp)
    out = jax.block_until_ready(mlp(x))
    ref = mlp_reference(x, mlp.params)
    assert out.shape == (batch, dims[-1])
    # bf16 MXU operands (f32 accumulate) -> loosened tolerance vs the fp32 reference
    assert jnp.allclose(out, ref, atol=5e-2, rtol=5e-2), "fused MLP mismatch vs reference"

    # --- full TabTransformer forward (embeddings/transformer in JAX, MLP via Pallas) ---
    categories = (3, 5, 4, 6)
    num_continuous = 4
    B = 8
    key, k_model = jax.random.split(key)
    model = TabTransformer(categories=categories, num_continuous=num_continuous,
                           dim=32, depth=2, heads=8, dim_head=16, dim_out=1,
                           mlp_hidden_mults=(4, 2), key=k_model)

    kc, kq = jax.random.split(jax.random.PRNGKey(1))
    maxes = jnp.asarray(categories, jnp.int32)
    u = jax.random.uniform(kc, (B, len(categories)))
    x_categ = jnp.minimum(jnp.floor(u * maxes).astype(jnp.int32), maxes - 1)
    x_cont = jax.random.normal(kq, (B, num_continuous), jnp.float32)

    logits = jax.block_until_ready(model(x_categ, x_cont))
    assert logits.shape == (B, 1)
    assert bool(jnp.all(jnp.isfinite(logits)))

    print("KERNEL_OK")
</pallas_src>

<mosaic_0001>
module attributes {stable_mosaic.version = 11 : i64} {
  func.func @_fused_mlp_kernel(%arg0: i32, %arg1: memref<8x128xf32, #tpu.memory_space<vmem>>, %arg2: memref<128x512xbf16, #tpu.memory_space<vmem>>, %arg3: memref<1x512xf32, #tpu.memory_space<vmem>>, %arg4: memref<512x256xbf16, #tpu.memory_space<vmem>>, %arg5: memref<1x256xf32, #tpu.memory_space<vmem>>, %arg6: memref<256x128xbf16, #tpu.memory_space<vmem>>, %arg7: memref<1x128xf32, #tpu.memory_space<vmem>>, %arg8: memref<8x128xf32, #tpu.memory_space<vmem>>) attributes {dimension_semantics = [#tpu.dimension_semantics<parallel>], iteration_bounds = array<i64: 1>, scalar_prefetch = 0 : i64, scratch_operands = 0 : i64, tpu.core_type = #tpu.core_type<tc>, window_params = [{transform_indices = @transform_0, window_bounds = array<i64: 8, 128>}, {pipeline_mode = #tpu.pipeline_mode<synchronous>, transform_indices = @transform_1, window_bounds = array<i64: 128, 512>}, {pipeline_mode = #tpu.pipeline_mode<synchronous>, transform_indices = @transform_2, window_bounds = array<i64: 1, 512>}, {pipeline_mode = #tpu.pipeline_mode<synchronous>, transform_indices = @transform_3, window_bounds = array<i64: 512, 256>}, {pipeline_mode = #tpu.pipeline_mode<synchronous>, transform_indices = @transform_4, window_bounds = array<i64: 1, 256>}, {pipeline_mode = #tpu.pipeline_mode<synchronous>, transform_indices = @transform_5, window_bounds = array<i64: 256, 128>}, {pipeline_mode = #tpu.pipeline_mode<synchronous>, transform_indices = @transform_6, window_bounds = array<i64: 1, 128>}, {transform_indices = @transform_7, window_bounds = array<i64: 8, 128>}]} {
    %c0 = arith.constant 0 : index
    %c0_0 = arith.constant 0 : index
    %0 = vector.load %arg1[%c0, %c0_0] : memref<8x128xf32, #tpu.memory_space<vmem>>, vector<8x128xf32>
    %1 = arith.truncf %0 : vector<8x128xf32> to vector<8x128xbf16>
    %c0_1 = arith.constant 0 : index
    %c0_2 = arith.constant 0 : index
    %2 = vector.load %arg2[%c0_1, %c0_2] : memref<128x512xbf16, #tpu.memory_space<vmem>>, vector<128x512xbf16>
    %c0_3 = arith.constant 0 : index
    %c0_4 = arith.constant 0 : index
    %3 = vector.load %arg3[%c0_3, %c0_4] : memref<1x512xf32, #tpu.memory_space<vmem>>, vector<1x512xf32>
    %cst = arith.constant dense<0.000000e+00> : vector<8x512xf32>
    %4 = tpu.matmul %1, %2, %cst {dimension_numbers = #tpu.dot_dimension_numbers<[1], [0], [0], [1], [0, 0, 1, 1], [], []>} : vector<8x128xbf16>, vector<128x512xbf16>, vector<8x512xf32> -> vector<8x512xf32>
    %5 = vector.broadcast %3 : vector<1x512xf32> to vector<8x512xf32>
    %6 = arith.addf %4, %5 : vector<8x512xf32>
    %cst_5 = arith.constant 5.000000e-01 : f32
    %7 = vector.broadcast %cst_5 : f32 to vector<8x512xf32>
    %8 = arith.mulf %7, %6 : vector<8x512xf32>
    %9 = math.tanh %8 : vector<8x512xf32>
    %cst_6 = arith.constant 1.000000e+00 : f32
    %10 = vector.broadcast %cst_6 : f32 to vector<8x512xf32>
    %11 = arith.addf %9, %10 : vector<8x512xf32>
    %cst_7 = arith.constant 5.000000e-01 : f32
    %12 = vector.broadcast %cst_7 : f32 to vector<8x512xf32>
    %13 = arith.mulf %12, %11 : vector<8x512xf32>
    %14 = arith.mulf %6, %13 : vector<8x512xf32>
    %15 = arith.truncf %14 : vector<8x512xf32> to vector<8x512xbf16>
    %c0_8 = arith.constant 0 : index
    %c0_9 = arith.constant 0 : index
    %16 = vector.load %arg4[%c0_8, %c0_9] : memref<512x256xbf16, #tpu.memory_space<vmem>>, vector<512x256xbf16>
    %c0_10 = arith.constant 0 : index
    %c0_11 = arith.constant 0 : index
    %17 = vector.load %arg5[%c0_10, %c0_11] : memref<1x256xf32, #tpu.memory_space<vmem>>, vector<1x256xf32>
    %cst_12 = arith.constant dense<0.000000e+00> : vector<8x256xf32>
    %18 = tpu.matmul %15, %16, %cst_12 {dimension_numbers = #tpu.dot_dimension_numbers<[1], [0], [0], [1], [0, 0, 1, 1], [], []>} : vector<8x512xbf16>, vector<512x256xbf16>, vector<8x256xf32> -> vector<8x256xf32>
    %19 = vector.broadcast %17 : vector<1x256xf32> to vector<8x256xf32>
    %20 = arith.addf %18, %19 : vector<8x256xf32>
    %cst_13 = arith.constant 5.000000e-01 : f32
    %21 = vector.broadcast %cst_13 : f32 to vector<8x256xf32>
    %22 = arith.mulf %21, %20 : vector<8x256xf32>
    %23 = math.tanh %22 : vector<8x256xf32>
    %cst_14 = arith.constant 1.000000e+00 : f32
    %24 = vector.broadcast %cst_14 : f32 to vector<8x256xf32>
    %25 = arith.addf %23, %24 : vector<8x256xf32>
    %cst_15 = arith.constant 5.000000e-01 : f32
    %26 = vector.broadcast %cst_15 : f32 to vector<8x256xf32>
    %27 = arith.mulf %26, %25 : vector<8x256xf32>
    %28 = arith.mulf %20, %27 : vector<8x256xf32>
    %29 = arith.truncf %28 : vector<8x256xf32> to vector<8x256xbf16>
    %c0_16 = arith.constant 0 : index
    %c0_17 = arith.constant 0 : index
    %30 = vector.load %arg6[%c0_16, %c0_17] : memref<256x128xbf16, #tpu.memory_space<vmem>>, vector<256x128xbf16>
    %c0_18 = arith.constant 0 : index
    %c0_19 = arith.constant 0 : index
    %31 = vector.load %arg7[%c0_18, %c0_19] : memref<1x128xf32, #tpu.memory_space<vmem>>, vector<1x128xf32>
    %cst_20 = arith.constant dense<0.000000e+00> : vector<8x128xf32>
    %32 = tpu.matmul %29, %30, %cst_20 {dimension_numbers = #tpu.dot_dimension_numbers<[1], [0], [0], [1], [0, 0, 1, 1], [], []>} : vector<8x256xbf16>, vector<256x128xbf16>, vector<8x128xf32> -> vector<8x128xf32>
    %33 = vector.broadcast %31 : vector<1x128xf32> to vector<8x128xf32>
    %34 = arith.addf %32, %33 : vector<8x128xf32>
    %c0_21 = arith.constant 0 : index
    %c0_22 = arith.constant 0 : index
    %35 = vector.load %arg8[%c0_21, %c0_22] : memref<8x128xf32, #tpu.memory_space<vmem>>, vector<8x128xf32>
    tpu.vector_store %arg8[%c0_21, %c0_22], %34 {strides = array<i32>} : memref<8x128xf32, #tpu.memory_space<vmem>>, vector<8x128xf32>,
    return
  }
  func.func @transform_0(%arg0: i32) -> (i32, i32) {
    %c0_i32 = arith.constant 0 : i32
    %c0_i32_0 = arith.constant 0 : i32
    return %arg0, %c0_i32 : i32, i32
  }
  func.func @transform_1(%arg0: i32) -> (i32, i32) {
    %c0_i32 = arith.constant 0 : i32
    %c0_i32_0 = arith.constant 0 : i32
    %c0_i32_1 = arith.constant 0 : i32
    return %c0_i32, %c0_i32_0 : i32, i32
  }
  func.func @transform_2(%arg0: i32) -> (i32, i32) {
    %c0_i32 = arith.constant 0 : i32
    %c0_i32_0 = arith.constant 0 : i32
    %c0_i32_1 = arith.constant 0 : i32
    return %c0_i32, %c0_i32_0 : i32, i32
  }
  func.func @transform_3(%arg0: i32) -> (i32, i32) {
    %c0_i32 = arith.constant 0 : i32
    %c0_i32_0 = arith.constant 0 : i32
    %c0_i32_1 = arith.constant 0 : i32
    return %c0_i32, %c0_i32_0 : i32, i32
  }
  func.func @transform_4(%arg0: i32) -> (i32, i32) {
    %c0_i32 = arith.constant 0 : i32
    %c0_i32_0 = arith.constant 0 : i32
    %c0_i32_1 = arith.constant 0 : i32
    return %c0_i32, %c0_i32_0 : i32, i32
  }
  func.func @transform_5(%arg0: i32) -> (i32, i32) {
    %c0_i32 = arith.constant 0 : i32
    %c0_i32_0 = arith.constant 0 : i32
    %c0_i32_1 = arith.constant 0 : i32
    return %c0_i32, %c0_i32_0 : i32, i32
  }
  func.func @transform_6(%arg0: i32) -> (i32, i32) {
    %c0_i32 = arith.constant 0 : i32
    %c0_i32_0 = arith.constant 0 : i32
    %c0_i32_1 = arith.constant 0 : i32
    return %c0_i32, %c0_i32_0 : i32, i32
  }
  func.func @transform_7(%arg0: i32) -> (i32, i32) {
    %c0_i32 = arith.constant 0 : i32
    %c0_i32_0 = arith.constant 0 : i32
    return %arg0, %c0_i32 : i32, i32
  }
}

module attributes {stable_mosaic.version = 11 : i64} {
  func.func @_fused_mlp_kernel(%arg0: i32, %arg1: memref<8x128xf32, #tpu.memory_space<vmem>>, %arg2: memref<128x512xbf16, #tpu.memory_space<vmem>>, %arg3: memref<1x512xf32, #tpu.memory_space<vmem>>, %arg4: memref<512x256xbf16, #tpu.memory_space<vmem>>, %arg5: memref<1x256xf32, #tpu.memory_space<vmem>>, %arg6: memref<256x128xbf16, #tpu.memory_space<vmem>>, %arg7: memref<1x128xf32, #tpu.memory_space<vmem>>, %arg8: memref<8x128xf32, #tpu.memory_space<vmem>>) attributes {dimension_semantics = [#tpu.dimension_semantics<parallel>], iteration_bounds = array<i64: 1>, scalar_prefetch = 0 : i64, scratch_operands = 0 : i64, tpu.core_type = #tpu.core_type<tc>, window_params = [{transform_indices = @transform_0, window_bounds = array<i64: 8, 128>}, {pipeline_mode = #tpu.pipeline_mode<synchronous>, transform_indices = @transform_1, window_bounds = array<i64: 128, 512>}, {pipeline_mode = #tpu.pipeline_mode<synchronous>, transform_indices = @transform_2, window_bounds = array<i64: 1, 512>}, {pipeline_mode = #tpu.pipeline_mode<synchronous>, transform_indices = @transform_3, window_bounds = array<i64: 512, 256>}, {pipeline_mode = #tpu.pipeline_mode<synchronous>, transform_indices = @transform_4, window_bounds = array<i64: 1, 256>}, {pipeline_mode = #tpu.pipeline_mode<synchronous>, transform_indices = @transform_5, window_bounds = array<i64: 256, 128>}, {pipeline_mode = #tpu.pipeline_mode<synchronous>, transform_indices = @transform_6, window_bounds = array<i64: 1, 128>}, {transform_indices = @transform_7, window_bounds = array<i64: 8, 128>}]} {
    %c0 = arith.constant 0 : index
    %c0_0 = arith.constant 0 : index
    %0 = vector.load %arg1[%c0, %c0_0] : memref<8x128xf32, #tpu.memory_space<vmem>>, vector<8x128xf32>
    %1 = arith.truncf %0 : vector<8x128xf32> to vector<8x128xbf16>
    %c0_1 = arith.constant 0 : index
    %c0_2 = arith.constant 0 : index
    %2 = vector.load %arg2[%c0_1, %c0_2] : memref<128x512xbf16, #tpu.memory_space<vmem>>, vector<128x512xbf16>
    %c0_3 = arith.constant 0 : index
    %c0_4 = arith.constant 0 : index
    %3 = vector.load %arg3[%c0_3, %c0_4] : memref<1x512xf32, #tpu.memory_space<vmem>>, vector<1x512xf32>
    %cst = arith.constant dense<0.000000e+00> : vector<8x512xf32>
    %4 = tpu.matmul %1, %2, %cst {dimension_numbers = #tpu.dot_dimension_numbers<[1], [0], [0], [1], [0, 0, 1, 1], [], []>} : vector<8x128xbf16>, vector<128x512xbf16>, vector<8x512xf32> -> vector<8x512xf32>
    %5 = vector.broadcast %3 : vector<1x512xf32> to vector<8x512xf32>
    %6 = arith.addf %4, %5 : vector<8x512xf32>
    %cst_5 = arith.constant 5.000000e-01 : f32
    %7 = vector.broadcast %cst_5 : f32 to vector<8x512xf32>
    %8 = arith.mulf %7, %6 : vector<8x512xf32>
    %9 = math.tanh %8 : vector<8x512xf32>
    %cst_6 = arith.constant 1.000000e+00 : f32
    %10 = vector.broadcast %cst_6 : f32 to vector<8x512xf32>
    %11 = arith.addf %9, %10 : vector<8x512xf32>
    %cst_7 = arith.constant 5.000000e-01 : f32
    %12 = vector.broadcast %cst_7 : f32 to vector<8x512xf32>
    %13 = arith.mulf %12, %11 : vector<8x512xf32>
    %14 = arith.mulf %6, %13 : vector<8x512xf32>
    %15 = arith.truncf %14 : vector<8x512xf32> to vector<8x512xbf16>
    %c0_8 = arith.constant 0 : index
    %c0_9 = arith.constant 0 : index
    %16 = vector.load %arg4[%c0_8, %c0_9] : memref<512x256xbf16, #tpu.memory_space<vmem>>, vector<512x256xbf16>
    %c0_10 = arith.constant 0 : index
    %c0_11 = arith.constant 0 : index
    %17 = vector.load %arg5[%c0_10, %c0_11] : memref<1x256xf32, #tpu.memory_space<vmem>>, vector<1x256xf32>
    %cst_12 = arith.constant dense<0.000000e+00> : vector<8x256xf32>
    %18 = tpu.matmul %15, %16, %cst_12 {dimension_numbers = #tpu.dot_dimension_numbers<[1], [0], [0], [1], [0, 0, 1, 1], [], []>} : vector<8x512xbf16>, vector<512x256xbf16>, vector<8x256xf32> -> vector<8x256xf32>
    %19 = vector.broadcast %17 : vector<1x256xf32> to vector<8x256xf32>
    %20 = arith.addf %18, %19 : vector<8x256xf32>
    %cst_13 = arith.constant 5.000000e-01 : f32
    %21 = vector.broadcast %cst_13 : f32 to vector<8x256xf32>
    %22 = arith.mulf %21, %20 : vector<8x256xf32>
    %23 = math.tanh %22 : vector<8x256xf32>
    %cst_14 = arith.constant 1.000000e+00 : f32
    %24 = vector.broadcast %cst_14 : f32 to vector<8x256xf32>
    %25 = arith.addf %23, %24 : vector<8x256xf32>
    %cst_15 = arith.constant 5.000000e-01 : f32
    %26 = vector.broadcast %cst_15 : f32 to vector<8x256xf32>
    %27 = arith.mulf %26, %25 : vector<8x256xf32>
    %28 = arith.mulf %20, %27 : vector<8x256xf32>
    %29 = arith.truncf %28 : vector<8x256xf32> to vector<8x256xbf16>
    %c0_16 = arith.constant 0 : index
    %c0_17 = arith.constant 0 : index
    %30 = vector.load %arg6[%c0_16, %c0_17] : memref<256x128xbf16, #tpu.memory_space<vmem>>, vector<256x128xbf16>
    %c0_18 = arith.constant 0 : index
    %c0_19 = arith.constant 0 : index
    %31 = vector.load %arg7[%c0_18, %c0_19] : memref<1x128xf32, #tpu.memory_space<vmem>>, vector<1x128xf32>
    %cst_20 = arith.constant dense<0.000000e+00> : vector<8x128xf32>
    %32 = tpu.matmul %29, %30, %cst_20 {dimension_numbers = #tpu.dot_dimension_numbers<[1], [0], [0], [1], [0, 0, 1, 1], [], []>} : vector<8x256xbf16>, vector<256x128xbf16>, vector<8x128xf32> -> vector<8x128xf32>
    %33 = vector.broadcast %31 : vector<1x128xf32> to vector<8x128xf32>
    %34 = arith.addf %32, %33 : vector<8x128xf32>
    %c0_21 = arith.constant 0 : index
    %c0_22 = arith.constant 0 : index
    %35 = vector.load %arg8[%c0_21, %c0_22] : memref<8x128xf32, #tpu.memory_space<vmem>>, vector<8x128xf32>
    tpu.vector_store %arg8[%c0_21, %c0_22], %34 {strides = array<i32>} : memref<8x128xf32, #tpu.memory_space<vmem>>, vector<8x128xf32>,
    return
  }
  func.func @transform_0(%arg0: i32) -> (i32, i32) {
    %c0_i32 = arith.constant 0 : i32
    %c0_i32_0 = arith.constant 0 : i32
    return %arg0, %c0_i32 : i32, i32
  }
  func.func @transform_1(%arg0: i32) -> (i32, i32) {
    %c0_i32 = arith.constant 0 : i32
    %c0_i32_0 = arith.constant 0 : i32
    %c0_i32_1 = arith.constant 0 : i32
    return %c0_i32, %c0_i32_0 : i32, i32
  }
  func.func @transform_2(%arg0: i32) -> (i32, i32) {
    %c0_i32 = arith.constant 0 : i32
    %c0_i32_0 = arith.constant 0 : i32
    %c0_i32_1 = arith.constant 0 : i32
    return %c0_i32, %c0_i32_0 : i32, i32
  }
  func.func @transform_3(%arg0: i32) -> (i32, i32) {
    %c0_i32 = arith.constant 0 : i32
    %c0_i32_0 = arith.constant 0 : i32
    %c0_i32_1 = arith.constant 0 : i32
    return %c0_i32, %c0_i32_0 : i32, i32
  }
  func.func @transform_4(%arg0: i32) -> (i32, i32) {
    %c0_i32 = arith.constant 0 : i32
    %c0_i32_0 = arith.constant 0 : i32
    %c0_i32_1 = arith.constant 0 : i32
    return %c0_i32, %c0_i32_0 : i32, i32
  }
  func.func @transform_5(%arg0: i32) -> (i32, i32) {
    %c0_i32 = arith.constant 0 : i32
    %c0_i32_0 = arith.constant 0 : i32
    %c0_i32_1 = arith.constant 0 : i32
    return %c0_i32, %c0_i32_0 : i32, i32
  }
  func.func @transform_6(%arg0: i32) -> (i32, i32) {
    %c0_i32 = arith.constant 0 : i32
    %c0_i32_0 = arith.constant 0 : i32
    %c0_i32_1 = arith.constant 0 : i32
    return %c0_i32, %c0_i32_0 : i32, i32
  }
  func.func @transform_7(%arg0: i32) -> (i32, i32) {
    %c0_i32 = arith.constant 0 : i32
    %c0_i32_0 = arith.constant 0 : i32
    return %arg0, %c0_i32 : i32, i32
  }
}

</mosaic_0001>

<bundles_post_ra>
// kernel: tpu_custom_call.1
= control target key start
LH: loop header
LB: loop body
LE: loop exit
PB: predicated region body
PF: predicated region fallthrough
CT: control target
= control target key end

     0   :  { %12 = vsyncpa [#allocation3], 0  ;;  %s1636_s0 = inlined_call_operand.hbm [shape: f32[8,128], index: 0, kind: input, shape index: {}]   ;;  %s1637_s1 = inlined_call_operand.hbm [shape: bf16[128,512], index: 1, kind: input, shape index: {}]   ;;  %s1638_s2 = inlined_call_operand.hbm [shape: f32[1,512], index: 2, kind: input, shape index: {}]   ;;  %s1639_s3 = inlined_call_operand.hbm [shape: bf16[512,256], index: 3, kind: input, shape index: {}]   ;;  %s1640_s4 = inlined_call_operand.vmem [shape: f32[1,256], index: 4, kind: input, shape index: {}]   ;;  %s1641_s5 = inlined_call_operand.hbm [shape: bf16[256,128], index: 5, kind: input, shape index: {}]   ;;  %s1642_s6 = inlined_call_operand.vmem [shape: f32[1,128], index: 6, kind: input, shape index: {}]   ;;  %s1643_s7 = inlined_call_operand.hbm [shape: f32[8,128], index: 7, kind: output, shape index: {}]  }
   0x1   :  { %13 = vsyncpa [#allocation6], 0 }
   0x2   :  { %14 = vsyncpa [#allocation9], 0 }
   0x3   :  { %15 = vsyncpa [#allocation4], 0  ;;  %s1545_s24 = smov [#allocation5]  }
   0x4   :  { %s31_s25 = sshll.u32 %s1545_s24, 4  ;;  %s32_s25 = int_to_ptr.vmem [resolvable:$true] %s31_s25 }
   0x5   :  { %s1425_s26 = scalar_lea.vmem %s32_s25, 4096  ;;  %p1430_p1 = scmp.lt.s32.totalorder %s32_s25, %s32_s25 }
   0x6   :  { %p1426_p0 = scmp.ne.s32.totalorder %s32_s25, %s1425_s26  ;;  %p1431_p2 = scmp.lt.s32.totalorder %s1425_s26, %s1425_s26 }
   0x8   :  { %p1432_p3 = por %p1431_p2, %p1430_p1 }
   0xa   :  { %p1433_p4 = pnand %p1432_p3, %p1426_p0 }
   0xc   :  { %1436 = shalt.err (!%p1433_p4)
}
   0xd   :  { %s1546_s27 = smov 256   ;;  %s1547_s28 = smov 16  }
   0xe   :  { %37 = dma.hbm_to_vmem [thread:$0]  %s1637_s1, 4096, %s32_s25, [#allocation6], %s1546_s27, %s1546_s27, %s1547_s28  }
   0xf   :  { %s1548_s8 = smov [#allocation8]  }
  0x10   :  { %s53_s9 = sshll.u32 %s1548_s8, 4  ;;  %s54_s9 = int_to_ptr.vmem [resolvable:$true] %s53_s9 }
  0x11   :  { %s1445_s10 = scalar_lea.vmem %s54_s9, 8192  ;;  %p1450_p6 = scmp.lt.s32.totalorder %s54_s9, %s54_s9 }
  0x12   :  { %p1446_p5 = scmp.ne.s32.totalorder %s54_s9, %s1445_s10  ;;  %p1451_p7 = scmp.lt.s32.totalorder %s1445_s10, %s1445_s10 }
  0x14   :  { %p1452_p8 = por %p1451_p7, %p1450_p6 }
  0x16   :  { %p1453_p9 = pnand %p1452_p8, %p1446_p5 }
  0x18   :  { %1456 = shalt.err (!%p1453_p9)
}
  0x19   :  { %s1549_s11 = smov 128   ;;  %s1550_s12 = smov 8  }
  0x1a   :  { %59 = dma.hbm_to_vmem [thread:$0]  %s1639_s3, 8192, %s54_s9, [#allocation9], %s1549_s11, %s1549_s11, %s1550_s12  }
  0x1b   :  { %s1551_s15 = smov [#allocation2]   ;;  %s1552_s17 = smov [#allocation7]  }
  0x1c   :  { %s22_s16 = sshll.u32 %s1551_s15, 4  ;;  %s44_s1 = sshll.u32 %s1552_s17, 4  ;;  %s23_s16 = int_to_ptr.vmem [resolvable:$true] %s22_s16  ;;  %s45_s1 = int_to_ptr.vmem [resolvable:$true] %s44_s1 }
  0x1d   :  { %s1465_s18 = scalar_lea.vmem %s23_s16, 128  ;;  %p1470_p11 = scmp.lt.s32.totalorder %s23_s16, %s23_s16 }
  0x1e   :  { %p1466_p10 = scmp.ne.s32.totalorder %s23_s16, %s1465_s18  ;;  %p1471_p12 = scmp.lt.s32.totalorder %s1465_s18, %s1465_s18 }
  0x20   :  { %p1472_p13 = por %p1471_p12, %p1470_p11 }
  0x22   :  { %p1473_p0 = pnand %p1472_p13, %p1466_p10 }
  0x24   :  { %1476 = shalt.err (!%p1473_p0)
}
  0x25   :  { %25 = dma.hbm_to_vmem [thread:$0]  %s1636_s0, 128, %s23_s16, [#allocation3]  }
  0x26   :  { %s1485_s21 = scalar_lea.vmem %s45_s1, 64  ;;  %p1490_p2 = scmp.lt.s32.totalorder %s45_s1, %s45_s1 }
  0x27   :  { %p1486_p1 = scmp.ne.s32.totalorder %s45_s1, %s1485_s21  ;;  %p1491_p3 = scmp.lt.s32.totalorder %s1485_s21, %s1485_s21 }
  0x29   :  { %p1492_p4 = por %p1491_p3, %p1490_p2 }
  0x2b   :  { %p1493_p5 = pnand %p1492_p4, %p1486_p1 }
  0x2d   :  { %1496 = shalt.err (!%p1493_p5)
}
  0x2e   :  { %47 = dma.hbm_to_vmem [thread:$0]  %s1638_s2, 64, %s45_s1, [#allocation6]  }
  0x2f   :  { %s1553_s23 = smov [#allocation10]  }
  0x30   :  { %s67_s24 = sshll.u32 %s1553_s23, 4  ;;  %s68_s24 = int_to_ptr.vmem [resolvable:$true] %s67_s24 }
  0x31   :  { %s1505_s25 = scalar_lea.vmem %s68_s24, 2048  ;;  %p1510_p7 = scmp.lt.s32.totalorder %s68_s24, %s68_s24 }
  0x32   :  { %p1506_p6 = scmp.ne.s32.totalorder %s68_s24, %s1505_s25  ;;  %p1511_p8 = scmp.lt.s32.totalorder %s1505_s25, %s1505_s25 }
  0x34   :  { %p1512_p9 = por %p1511_p8, %p1510_p7 }
  0x36   :  { %p1513_p10 = pnand %p1512_p9, %p1506_p6 }
  0x38   :  { %1516 = shalt.err (!%p1513_p10)
}
  0x39   :  { %s1554_s0 = smov 64   ;;  %s1555_s26 = smov 4  }
  0x3a   :  { %73 = dma.hbm_to_vmem [thread:$0]  %s1641_s5, 2048, %s68_s24, [#allocation9], %s1554_s0, %s1554_s0, %s1555_s26  }
  0x3b   :  { %1537 = dma.done.wait [#allocation3], 128  }
  0x3c   :  { %1538 = vsyncadd [#allocation3], 4294967168 }
  0x3d   :  { %1539 = dma.done.wait [#allocation6], 4160  }
  0x3e   :  { %1540 = vsyncadd [#allocation6], 4294963136 }
  0x3f   :  { %1541 = dma.done.wait [#allocation9], 10240  }
  0x40   :  { %1542 = vsyncadd [#allocation9], 4294957056  ;;  %v1556_v0 = vmov 0   ;;  %v1245_v1 = vld [vmem:[#allocation5 + $0xe4] ss:$16 sps:$4 sm:$0xff]   ;;  %v92_v33 = vld [vmem:[#allocation2] sm:$0xff] }
  0x41   :  { %340 = vmatprep.mubr.bf16.mxu0 %v1556_v0  ;;  %381 = vmatprep.mubr.bf16.mxu1 %v1556_v0  ;;  %v1247_v2 = vld [vmem:[#allocation5 + $0xec] ss:$16 sps:$4 sm:$0xff]   ;;  %v1249_v3 = vld [vmem:[#allocation5 + $0xe0] ss:$16 sps:$4 sm:$0xff]   ;;  %v1250_v4 = vld [vmem:[#allocation5 + $0xe8] ss:$16 sps:$4 sm:$0xff]   ;;  %v93_v36 = vpack.c.bf16 %v92_v33, %v92_v33 }
  0x42   :  { %308 = vmatprep.subr.bf16.mxu0 %v1245_v1  ;;  %349 = vmatprep.subr.bf16.mxu1 %v1247_v2  ;;  %v1251_v5 = vld [vmem:[#allocation5 + $0xc4] ss:$16 sps:$4 sm:$0xff]   ;;  %v1253_v6 = vld [vmem:[#allocation5 + $0xcc] ss:$16 sps:$4 sm:$0xff]   ;;  %v1255_v7 = vld [vmem:[#allocation5 + $0xc0] ss:$16 sps:$4 sm:$0xff]  }
  0x43   :  { %309 = vmatpush1.bf16.msra.mxu0 %v1249_v3  ;;  %350 = vmatpush1.bf16.msra.mxu1 %v1250_v4  ;;  %v1256_v8 = vld [vmem:[#allocation5 + $0xc8] ss:$16 sps:$4 sm:$0xff]   ;;  %v1257_v9 = vld [vmem:[#allocation5 + $0xa4] ss:$16 sps:$4 sm:$0xff]   ;;  %v1259_v10 = vld [vmem:[#allocation5 + $0xac] ss:$16 sps:$4 sm:$0xff]  }
  0x44   :  { %310 = vmatprep.subr.bf16.mxu0 %v1251_v5  ;;  %351 = vmatprep.subr.bf16.mxu1 %v1253_v6  ;;  %v1261_v11 = vld [vmem:[#allocation5 + $0xa0] ss:$16 sps:$4 sm:$0xff]   ;;  %v1262_v12 = vld [vmem:[#allocation5 + $0xa8] ss:$16 sps:$4 sm:$0xff]   ;;  %v1263_v13 = vld [vmem:[#allocation5 + $0x84] ss:$16 sps:$4 sm:$0xff]  }
  0x45   :  { %v1265_v14 = vld [vmem:[#allocation5 + $0x8c] ss:$16 sps:$4 sm:$0xff]   ;;  %v1267_v15 = vld [vmem:[#allocation5 + $0x80] ss:$16 sps:$4 sm:$0xff]   ;;  %v1268_v16 = vld [vmem:[#allocation5 + $0x88] ss:$16 sps:$4 sm:$0xff]  }
  0x46   :  { %v1269_v17 = vld [vmem:[#allocation5 + $0x64] ss:$16 sps:$4 sm:$0xff]   ;;  %v1271_v18 = vld [vmem:[#allocation5 + $0x6c] ss:$16 sps:$4 sm:$0xff]   ;;  %v1273_v19 = vld [vmem:[#allocation5 + $0x60] ss:$16 sps:$4 sm:$0xff]  }
  0x47   :  { %311 = vmatpush1.bf16.msra.mxu0 %v1255_v7  ;;  %352 = vmatpush1.bf16.msra.mxu1 %v1256_v8  ;;  %v1274_v20 = vld [vmem:[#allocation5 + $0x68] ss:$16 sps:$4 sm:$0xff]   ;;  %v1275_v21 = vld [vmem:[#allocation5 + $0x44] ss:$16 sps:$4 sm:$0xff]   ;;  %v1277_v22 = vld [vmem:[#allocation5 + $0x4c] ss:$16 sps:$4 sm:$0xff]  }
  0x48   :  { %312 = vmatprep.subr.bf16.mxu0 %v1257_v9  ;;  %353 = vmatprep.subr.bf16.mxu1 %v1259_v10  ;;  %v1279_v23 = vld [vmem:[#allocation5 + $0x40] ss:$16 sps:$4 sm:$0xff]   ;;  %v1280_v24 = vld [vmem:[#allocation5 + $0x48] ss:$16 sps:$4 sm:$0xff]   ;;  %v1281_v25 = vld [vmem:[#allocation5 + $0x24] ss:$16 sps:$4 sm:$0xff]  }
  0x49   :  { %v1283_v26 = vld [vmem:[#allocation5 + $0x2c] ss:$16 sps:$4 sm:$0xff]   ;;  %v1285_v27 = vld [vmem:[#allocation5 + $0x20] ss:$16 sps:$4 sm:$0xff]   ;;  %v1286_v28 = vld [vmem:[#allocation5 + $0x28] ss:$16 sps:$4 sm:$0xff]  }
  0x4a   :  { %v1287_v29 = vld [vmem:[#allocation5 + $0x4] ss:$16 sps:$4 sm:$0xff]   ;;  %v1289_v30 = vld [vmem:[#allocation5 + $0xc] ss:$16 sps:$4 sm:$0xff]   ;;  %v1291_v31 = vld [vmem:[#allocation5] ss:$16 sps:$4 sm:$0xff]  }
  0x4b   :  { %313 = vmatpush1.bf16.msra.mxu0 %v1261_v11  ;;  %354 = vmatpush1.bf16.msra.mxu1 %v1262_v12  ;;  %v1292_v32 = vld [vmem:[#allocation5 + $0x8] ss:$16 sps:$4 sm:$0xff]   ;;  %v1293_v37 = vld [vmem:[#allocation8 + $0x70] ss:$8 sps:$4 sm:$0xff]   ;;  %v1299_v41 = vld [vmem:[#allocation8 + $0x60] ss:$8 sps:$4 sm:$0xff]  }
  0x4c   :  { %314 = vmatprep.subr.bf16.mxu0 %v1263_v13  ;;  %355 = vmatprep.subr.bf16.mxu1 %v1265_v14  ;;  %v1295_v34 = vld [vmem:[#allocation8 + $0x74] ss:$8 sps:$4 sm:$0xff]   ;;  %v1296_v38 = vld [vmem:[#allocation8 + $0x170] ss:$8 sps:$4 sm:$0xff]   ;;  %v1301_v39 = vld [vmem:[#allocation8 + $0x64] ss:$8 sps:$4 sm:$0xff]  }
  0x4d   :  { %v1298_v35 = vld [vmem:[#allocation8 + $0x174] ss:$8 sps:$4 sm:$0xff]   ;;  %v1304_v40 = vld [vmem:[#allocation8 + $0x164] ss:$8 sps:$4 sm:$0xff]   ;;  %v1302_v42 = vld [vmem:[#allocation8 + $0x160] ss:$8 sps:$4 sm:$0xff]  }
  0x4e   :  { %v1307_v43 = vld [vmem:[#allocation8 + $0x54] ss:$8 sps:$4 sm:$0xff]   ;;  %v1305_v45 = vld [vmem:[#allocation8 + $0x50] ss:$8 sps:$4 sm:$0xff]   ;;  %v1313_v47 = vld [vmem:[#allocation8 + $0x44] ss:$8 sps:$4 sm:$0xff]  }
  0x4f   :  { %315 = vmatpush1.bf16.msra.mxu0 %v1267_v15  ;;  %356 = vmatpush1.bf16.msra.mxu1 %v1268_v16  ;;  %v1310_v44 = vld [vmem:[#allocation8 + $0x154] ss:$8 sps:$4 sm:$0xff]   ;;  %v1308_v46 = vld [vmem:[#allocation8 + $0x150] ss:$8 sps:$4 sm:$0xff]   ;;  %v1316_v48 = vld [vmem:[#allocation8 + $0x144] ss:$8 sps:$4 sm:$0xff]  }
  0x50   :  { %316 = vmatprep.subr.bf16.mxu0 %v1269_v17  ;;  %357 = vmatprep.subr.bf16.mxu1 %v1271_v18  ;;  %v1311_v49 = vld [vmem:[#allocation8 + $0x40] ss:$8 sps:$4 sm:$0xff]   ;;  %v1319_v51 = vld [vmem:[#allocation8 + $0x34] ss:$8 sps:$4 sm:$0xff]   ;;  %v1317_v53 = vld [vmem:[#allocation8 + $0x30] ss:$8 sps:$4 sm:$0xff]  }
  0x51   :  { %v1314_v50 = vld [vmem:[#allocation8 + $0x140] ss:$8 sps:$4 sm:$0xff]   ;;  %v1322_v52 = vld [vmem:[#allocation8 + $0x134] ss:$8 sps:$4 sm:$0xff]   ;;  %v1320_v54 = vld [vmem:[#allocation8 + $0x130] ss:$8 sps:$4 sm:$0xff]  }
  0x52   :  { %v1325_v55 = vld [vmem:[#allocation8 + $0x24] ss:$8 sps:$4 sm:$0xff]   ;;  %v1323_v57 = vld [vmem:[#allocation8 + $0x20] ss:$8 sps:$4 sm:$0xff]   ;;  %v1331_v59 = vld [vmem:[#allocation8 + $0x14] ss:$8 sps:$4 sm:$0xff]  }
  0x53   :  { %317 = vmatpush1.bf16.msra.mxu0 %v1273_v19  ;;  %358 = vmatpush1.bf16.msra.mxu1 %v1274_v20  ;;  %v1328_v56 = vld [vmem:[#allocation8 + $0x124] ss:$8 sps:$4 sm:$0xff]   ;;  %v1326_v58 = vld [vmem:[#allocation8 + $0x120] ss:$8 sps:$4 sm:$0xff]   ;;  %v1334_v60 = vld [vmem:[#allocation8 + $0x114] ss:$8 sps:$4 sm:$0xff]  }
  0x54   :  { %318 = vmatprep.subr.bf16.mxu0 %v1275_v21  ;;  %359 = vmatprep.subr.bf16.mxu1 %v1277_v22  ;;  %v1329_v61 = vld [vmem:[#allocation8 + $0x10] ss:$8 sps:$4 sm:$0xff]   ;;  %v1337_v63 = vld [vmem:[#allocation8 + $0x4] ss:$8 sps:$4 sm:$0xff]   ;;  %v1335_v1 = vld [vmem:[#allocation8] ss:$8 sps:$4 sm:$0xff]  }
  0x55   :  { %v1332_v62 = vld [vmem:[#allocation8 + $0x110] ss:$8 sps:$4 sm:$0xff]   ;;  %v1340_v0 = vld [vmem:[#allocation8 + $0x104] ss:$8 sps:$4 sm:$0xff]   ;;  %v1338_v2 = vld [vmem:[#allocation8 + $0x100] ss:$8 sps:$4 sm:$0xff]  }
  0x56   :  { %v1343_v3 = vld [vmem:[#allocation8 + $0xf4] ss:$8 sps:$4 sm:$0xff]   ;;  %v1341_v5 = vld [vmem:[#allocation8 + $0xf0] ss:$8 sps:$4 sm:$0xff]   ;;  %v1349_v7 = vld [vmem:[#allocation8 + $0xe4] ss:$8 sps:$4 sm:$0xff]  }
  0x57   :  { %319 = vmatpush1.bf16.msra.mxu0 %v1279_v23  ;;  %360 = vmatpush1.bf16.msra.mxu1 %v1280_v24  ;;  %v1346_v4 = vld [vmem:[#allocation8 + $0x1f4] ss:$8 sps:$4 sm:$0xff]   ;;  %v1344_v6 = vld [vmem:[#allocation8 + $0x1f0] ss:$8 sps:$4 sm:$0xff]   ;;  %v1352_v8 = vld [vmem:[#allocation8 + $0x1e4] ss:$8 sps:$4 sm:$0xff]  }
  0x58   :  { %320 = vmatprep.subr.bf16.mxu0 %v1281_v25  ;;  %361 = vmatprep.subr.bf16.mxu1 %v1283_v26  ;;  %v1347_v9 = vld [vmem:[#allocation8 + $0xe0] ss:$8 sps:$4 sm:$0xff]   ;;  %v1355_v11 = vld [vmem:[#allocation8 + $0xd4] ss:$8 sps:$4 sm:$0xff]   ;;  %v1353_v13 = vld [vmem:[#allocation8 + $0xd0] ss:$8 sps:$4 sm:$0xff]  }
  0x59   :  { %v1350_v10 = vld [vmem:[#allocation8 + $0x1e0] ss:$8 sps:$4 sm:$0xff]   ;;  %v1358_v12 = vld [vmem:[#allocation8 + $0x1d4] ss:$8 sps:$4 sm:$0xff]   ;;  %v1356_v14 = vld [vmem:[#allocation8 + $0x1d0] ss:$8 sps:$4 sm:$0xff]  }
  0x5a   :  { %v1361_v15 = vld [vmem:[#allocation8 + $0xc4] ss:$8 sps:$4 sm:$0xff]   ;;  %v1359_v17 = vld [vmem:[#allocation8 + $0xc0] ss:$8 sps:$4 sm:$0xff]   ;;  %v1367_v19 = vld [vmem:[#allocation8 + $0xb4] ss:$8 sps:$4 sm:$0xff]  }
  0x5b   :  { %321 = vmatpush1.bf16.msra.mxu0 %v1285_v27  ;;  %362 = vmatpush1.bf16.msra.mxu1 %v1286_v28  ;;  %v1364_v16 = vld [vmem:[#allocation8 + $0x1c4] ss:$8 sps:$4 sm:$0xff]   ;;  %v1362_v18 = vld [vmem:[#allocation8 + $0x1c0] ss:$8 sps:$4 sm:$0xff]   ;;  %v1370_v20 = vld [vmem:[#allocation8 + $0x1b4] ss:$8 sps:$4 sm:$0xff]  }
  0x5c   :  { %322 = vmatprep.subr.bf16.mxu0 %v1287_v29  ;;  %363 = vmatprep.subr.bf16.mxu1 %v1289_v30  ;;  %v1365_v21 = vld [vmem:[#allocation8 + $0xb0] ss:$8 sps:$4 sm:$0xff]   ;;  %v1373_v23 = vld [vmem:[#allocation8 + $0xa4] ss:$8 sps:$4 sm:$0xff]   ;;  %v1371_v25 = vld [vmem:[#allocation8 + $0xa0] ss:$8 sps:$4 sm:$0xff]  }
  0x5d   :  { %v1368_v22 = vld [vmem:[#allocation8 + $0x1b0] ss:$8 sps:$4 sm:$0xff]   ;;  %v1376_v24 = vld [vmem:[#allocation8 + $0x1a4] ss:$8 sps:$4 sm:$0xff]   ;;  %v1374_v26 = vld [vmem:[#allocation8 + $0x1a0] ss:$8 sps:$4 sm:$0xff]  }
  0x5e   :  { %v1379_v27 = vld [vmem:[#allocation8 + $0x94] ss:$8 sps:$4 sm:$0xff]   ;;  %v1377_v29 = vld [vmem:[#allocation8 + $0x90] ss:$8 sps:$4 sm:$0xff]   ;;  %v1383_v33 = vld [vmem:[#allocation8 + $0x80] ss:$8 sps:$4 sm:$0xff]  }
  0x5f   :  { %323 = vmatpush1.bf16.msra.mxu0 %v1291_v31  ;;  %364 = vmatpush1.bf16.msra.mxu1 %v1292_v32  ;;  %v1382_v28 = vld [vmem:[#allocation8 + $0x194] ss:$8 sps:$4 sm:$0xff]   ;;  %v1380_v30 = vld [vmem:[#allocation8 + $0x190] ss:$8 sps:$4 sm:$0xff]   ;;  %v1385_v31 = vld [vmem:[#allocation8 + $0x84] ss:$8 sps:$4 sm:$0xff]  }
  0x60   :  { %810 = vmatprep.subr.bf16.mxu0 %v1295_v34  ;;  %851 = vmatprep.subr.bf16.mxu1 %v1298_v35  ;;  %v1388_v32 = vld [vmem:[#allocation8 + $0x184] ss:$8 sps:$4 sm:$0xff]   ;;  %v1386_v34 = vld [vmem:[#allocation8 + $0x180] ss:$8 sps:$4 sm:$0xff]   ;;  %v128_v35 = vlaneseq  ;;  %s1557_s30 = smov [#allocation11]  }
  0x61   :  { %s1086_s8 = sshll.u32 %s1557_s30, 4  ;;  %s1087_s8 = int_to_ptr.vmem [resolvable:$true] %s1086_s8 }
  0x62   :  { %341 = vmatmul.mubr.bf16.vlgmr.msra.gmra.mxu0 %v93_v36  ;;  %382 = vmatmul.mubr.bf16.vlgmr.msra.gmra.mxu1 %v93_v36  ;;  %v1613_v36 = vshrl.u32 %v128_v35, 7  ;;  %s1517_s9 = scalar_lea.vmem %s1087_s8, 128  ;;  %p1522_p12 = scmp.lt.s32.totalorder %s1087_s8, %s1087_s8 }
  0x63   :  { %811 = vmatpush1.bf16.msra.mxu0 %v1293_v37  ;;  %852 = vmatpush1.bf16.msra.mxu1 %v1296_v38  ;;  %p1518_p11 = scmp.ne.s32.totalorder %s1087_s8, %s1517_s9  ;;  %p1523_p13 = scmp.lt.s32.totalorder %s1517_s9, %s1517_s9 }
  0x64   :  { %812 = vmatprep.subr.bf16.mxu0 %v1301_v39  ;;  %853 = vmatprep.subr.bf16.mxu1 %v1304_v40  ;;  %v130_v37 = vsub.s32 0, %v1613_v36  ;;  %v138_v38 = vsub.s32 2, %v1613_v36  ;;  %v126_v39 = vld [vmem:[#allocation7] sm:$0xf]  ;;  %v134_v40 = vsub.s32 1, %v1613_v36 }
  0x65   :  { %p1524_p0 = por %p1523_p13, %p1522_p12 }
  0x67   :  { %813 = vmatpush1.bf16.msra.mxu0 %v1299_v41  ;;  %854 = vmatpush1.bf16.msra.mxu1 %v1302_v42  ;;  %v142_v41 = vsub.s32 3, %v1613_v36  ;;  %v131_v42 = vrot.slane %v126_v39, %v130_v37  ;;  %p1525_p1 = pnand %p1524_p0, %p1518_p11 }
  0x68   :  { %814 = vmatprep.subr.bf16.mxu0 %v1307_v43  ;;  %855 = vmatprep.subr.bf16.mxu1 %v1310_v44  ;;  %v139_v43 = vrot.slane %v126_v39, %v138_v38  ;;  %v135_v44 = vrot.slane %v126_v39, %v134_v40 }
  0x6b   :  { %815 = vmatpush1.bf16.msra.mxu0 %v1305_v45  ;;  %856 = vmatpush1.bf16.msra.mxu1 %v1308_v46  ;;  %v143_v45 = vrot.slane %v126_v39, %v142_v41 }
  0x6c   :  { %816 = vmatprep.subr.bf16.mxu0 %v1313_v47  ;;  %857 = vmatprep.subr.bf16.mxu1 %v1316_v48 }
  0x6f   :  { %817 = vmatpush1.bf16.msra.mxu0 %v1311_v49  ;;  %858 = vmatpush1.bf16.msra.mxu1 %v1314_v50 }
  0x70   :  { %818 = vmatprep.subr.bf16.mxu0 %v1319_v51  ;;  %859 = vmatprep.subr.bf16.mxu1 %v1322_v52 }
  0x73   :  { %819 = vmatpush1.bf16.msra.mxu0 %v1317_v53  ;;  %860 = vmatpush1.bf16.msra.mxu1 %v1320_v54 }
  0x74   :  { %820 = vmatprep.subr.bf16.mxu0 %v1325_v55  ;;  %861 = vmatprep.subr.bf16.mxu1 %v1328_v56 }
  0x77   :  { %821 = vmatpush1.bf16.msra.mxu0 %v1323_v57  ;;  %862 = vmatpush1.bf16.msra.mxu1 %v1326_v58 }
  0x78   :  { %822 = vmatprep.subr.bf16.mxu0 %v1331_v59  ;;  %863 = vmatprep.subr.bf16.mxu1 %v1334_v60 }
  0x7b   :  { %823 = vmatpush1.bf16.msra.mxu0 %v1329_v61  ;;  %864 = vmatpush1.bf16.msra.mxu1 %v1332_v62 }
  0x7c   :  { %824 = vmatprep.subr.bf16.mxu0 %v1337_v63  ;;  %865 = vmatprep.subr.bf16.mxu1 %v1340_v0 }
  0x7f   :  { %825 = vmatpush1.bf16.msra.mxu0 %v1335_v1  ;;  %866 = vmatpush1.bf16.msra.mxu1 %v1338_v2 }
  0x80   :  { %826 = vmatprep.subr.bf16.mxu0 %v1343_v3  ;;  %867 = vmatprep.subr.bf16.mxu1 %v1346_v4 }
  0x83   :  { %827 = vmatpush2.bf16.msra.mxu0 %v1341_v5  ;;  %868 = vmatpush2.bf16.msra.mxu1 %v1344_v6 }
  0x84   :  { %828 = vmatprep.subr.bf16.mxu0 %v1349_v7  ;;  %869 = vmatprep.subr.bf16.mxu1 %v1352_v8 }
  0x87   :  { %829 = vmatpush2.bf16.msra.mxu0 %v1347_v9  ;;  %870 = vmatpush2.bf16.msra.mxu1 %v1350_v10 }
  0x88   :  { %830 = vmatprep.subr.bf16.mxu0 %v1355_v11  ;;  %871 = vmatprep.subr.bf16.mxu1 %v1358_v12 }
  0x8b   :  { %831 = vmatpush2.bf16.msra.mxu0 %v1353_v13  ;;  %872 = vmatpush2.bf16.msra.mxu1 %v1356_v14 }
  0x8c   :  { %832 = vmatprep.subr.bf16.mxu0 %v1361_v15  ;;  %873 = vmatprep.subr.bf16.mxu1 %v1364_v16 }
  0x8f   :  { %833 = vmatpush2.bf16.msra.mxu0 %v1359_v17  ;;  %874 = vmatpush2.bf16.msra.mxu1 %v1362_v18  ;;  %v1389_v18 = vld [vmem:[#allocation10 + $0x78] sm:$0xff]  }
  0x90   :  { %834 = vmatprep.subr.bf16.mxu0 %v1367_v19  ;;  %875 = vmatprep.subr.bf16.mxu1 %v1370_v20  ;;  %v1390_v19 = vld [vmem:[#allocation10 + $0x38] sm:$0xff]   ;;  %v1391_v20 = vld [vmem:[#allocation10 + $0x70] sm:$0xff]  }
  0x93   :  { %835 = vmatpush2.bf16.msra.mxu0 %v1365_v21  ;;  %876 = vmatpush2.bf16.msra.mxu1 %v1368_v22  ;;  %v1392_v21 = vld [vmem:[#allocation10 + $0x30] sm:$0xff]   ;;  %v1393_v22 = vld [vmem:[#allocation10 + $0x68] sm:$0xff]  }
  0x94   :  { %836 = vmatprep.subr.bf16.mxu0 %v1373_v23  ;;  %877 = vmatprep.subr.bf16.mxu1 %v1376_v24  ;;  %v1394_v23 = vld [vmem:[#allocation10 + $0x28] sm:$0xff]   ;;  %v1395_v24 = vld [vmem:[#allocation10 + $0x60] sm:$0xff]  }
  0x97   :  { %837 = vmatpush2.bf16.msra.mxu0 %v1371_v25  ;;  %878 = vmatpush2.bf16.msra.mxu1 %v1374_v26  ;;  %v1396_v25 = vld [vmem:[#allocation10 + $0x20] sm:$0xff]   ;;  %v1397_v26 = vld [vmem:[#allocation10 + $0x58] sm:$0xff]  }
  0x98   :  { %838 = vmatprep.subr.bf16.mxu0 %v1379_v27  ;;  %879 = vmatprep.subr.bf16.mxu1 %v1382_v28  ;;  %v1398_v27 = vld [vmem:[#allocation10 + $0x18] sm:$0xff]   ;;  %v1399_v28 = vld [vmem:[#allocation10 + $0x50] sm:$0xff]  }
  0x9b   :  { %839 = vmatpush2.bf16.msra.mxu0 %v1377_v29  ;;  %880 = vmatpush2.bf16.msra.mxu1 %v1380_v30  ;;  %v1400_v29 = vld [vmem:[#allocation10 + $0x10] sm:$0xff]   ;;  %v1401_v30 = vld [vmem:[#allocation10 + $0x48] sm:$0xff]  }
  0x9c   :  { %840 = vmatprep.subr.bf16.mxu0 %v1385_v31  ;;  %881 = vmatprep.subr.bf16.mxu1 %v1388_v32  ;;  %v1402_v31 = vld [vmem:[#allocation10 + $0x8] sm:$0xff]   ;;  %v1403_v32 = vld [vmem:[#allocation10 + $0x40] sm:$0xff]  }
  0x9f   :  { %841 = vmatpush2.bf16.msra.mxu0 %v1383_v33  ;;  %882 = vmatpush2.bf16.msra.mxu1 %v1386_v34  ;;  %v1404_v33 = vld [vmem:[#allocation10] sm:$0xff]   ;;  %v478_v34 = vld [vmem:[%s1640_s4] sm:$0x3] }
  0xa0   :  { %1210 = vmatprep.subr.bf16.mxu0 %v1389_v18  ;;  %v483_v35 = vrot.slane %v478_v34, %v130_v37  ;;  %v487_v38 = vrot.slane %v478_v34, %v134_v40 }
 0x122   :  { %v342_v46 = vpop.f32.mrf.mxu0  ;;  %v383_v47 = vpop.f32.mrf.mxu1 }
 0x123   :  { %v343_v48 = vadd.f32 %v342_v46, %v131_v42  ;;  %v384_v49 = vadd.f32 %v383_v47, %v139_v43 }
 0x124   :  { %v344_v50 = vpop.f32.mrf.mxu0  ;;  %v385_v51 = vpop.f32.mrf.mxu1 }
 0x125   :  { %v390_v52 = vmul.f32 0.5, %v343_v48  ;;  %v392_v53 = vmul.f32 0.5, %v384_v49  ;;  %v345_v54 = vadd.f32 %v344_v50, %v135_v44  ;;  %v386_v55 = vadd.f32 %v385_v51, %v143_v45 }
 0x126   :  { %v346_v56 = vpop.f32.mrf.mxu0  ;;  %v387_v57 = vpop.f32.mrf.mxu1 }
 0x127   :  { %1405 = vtanh.f32 %v390_v52  ;;  %v391_v58 = vmul.f32 0.5, %v345_v54  ;;  %v393_v59 = vmul.f32 0.5, %v386_v55 }
 0x128   :  { %1407 = vtanh.f32 %v392_v53  ;;  %v347_v60 = vpop.f32.mrf.mxu0  ;;  %v388_v61 = vpop.f32.mrf.mxu1 }
 0x129   :  { %1409 = vtanh.f32 %v391_v58 }
 0x12a   :  { %1411 = vtanh.f32 %v393_v59 }
 0x134   :  { %v1406_v62 = vpop.eup %1405 }
 0x135   :  { %v1408_v63 = vpop.eup %1407  ;;  %v398_v0 = vadd.f32 1.0, %v1406_v62  ;;  %v1193_v62 = vld [vmem:[%s1642_s6] ss:$0 sm:$0xff] }
 0x136   :  { %v1410_v1 = vpop.eup %1409  ;;  %v400_v2 = vadd.f32 1.0, %v1408_v63 }
 0x137   :  { %v1412_v3 = vpop.eup %1411  ;;  %v402_v4 = vmul.f32 0.5, %v398_v0  ;;  %v399_v5 = vadd.f32 1.0, %v1410_v1 }
 0x138   :  { %v404_v6 = vmul.f32 0.5, %v400_v2  ;;  %v401_v7 = vadd.f32 1.0, %v1412_v3 }
 0x139   :  { %v403_v8 = vmul.f32 0.5, %v399_v5  ;;  %v406_v9 = vmul.f32 %v402_v4, %v343_v48 }
 0x13a   :  { %v405_v10 = vmul.f32 0.5, %v401_v7  ;;  %v408_v11 = vmul.f32 %v404_v6, %v384_v49 }
 0x13b   :  { %v407_v12 = vmul.f32 %v403_v8, %v345_v54  ;;  %v410_v15 = vpack.c.bf16 %v406_v9, %v406_v9 }
 0x13c   :  { %v409_v13 = vmul.f32 %v405_v10, %v386_v55  ;;  %v412_v17 = vpack.c.bf16 %v408_v11, %v408_v11 }
 0x13d   :  { %v411_v14 = vpack.c.bf16 %v407_v12, %v407_v12 }
 0x13e   :  { %v413_v16 = vpack.c.bf16 %v409_v13, %v409_v13 }
 0x13f   :  { %842 = vmatprep.mubr.bf16.mxu0 %v411_v14 }
 0x140   :  { %883 = vmatprep.mubr.bf16.mxu1 %v413_v16  ;;  %843 = vmatmul.mubr.bf16.vlgmr.msra.gmra.mxu0 %v410_v15 }
 0x141   :  { %884 = vmatmul.mubr.bf16.vlgmr.msra.gmra.mxu1 %v412_v17  ;;  %1211 = vmatpush3.bf16.msra.mxu0 %v1390_v19 }
 0x142   :  { %1212 = vmatprep.subr.bf16.mxu0 %v1391_v20 }
 0x145   :  { %1213 = vmatpush3.bf16.msra.mxu0 %v1392_v21 }
 0x146   :  { %1214 = vmatprep.subr.bf16.mxu0 %v1393_v22 }
 0x149   :  { %1215 = vmatpush3.bf16.msra.mxu0 %v1394_v23 }
 0x14a   :  { %1216 = vmatprep.subr.bf16.mxu0 %v1395_v24 }
 0x14d   :  { %1217 = vmatpush3.bf16.msra.mxu0 %v1396_v25 }
 0x14e   :  { %1218 = vmatprep.subr.bf16.mxu0 %v1397_v26 }
 0x151   :  { %1219 = vmatpush3.bf16.msra.mxu0 %v1398_v27 }
 0x152   :  { %1220 = vmatprep.subr.bf16.mxu0 %v1399_v28 }
 0x155   :  { %1221 = vmatpush3.bf16.msra.mxu0 %v1400_v29 }
 0x156   :  { %1222 = vmatprep.subr.bf16.mxu0 %v1401_v30 }
 0x159   :  { %1223 = vmatpush3.bf16.msra.mxu0 %v1402_v31 }
 0x15a   :  { %1224 = vmatprep.subr.bf16.mxu0 %v1403_v32 }
 0x15d   :  { %1225 = vmatpush3.bf16.msra.mxu0 %v1404_v33 }
 0x200   :  { %v844_v39 = vpop.f32.mrf.mxu0 }
 0x201   :  { %v845_v41 = vadd.f32 %v844_v39, %v483_v35  ;;  %v885_v42 = vpop.f32.mrf.mxu1 }
 0x202   :  { %v846_v43 = vpop.f32.mrf.mxu0 }
 0x203   :  { %v886_v44 = vadd.f32 %v885_v42, %v845_v41  ;;  %v847_v45 = vadd.f32 %v846_v43, %v487_v38  ;;  %v887_v46 = vpop.f32.mrf.mxu1 }
 0x204   :  { %v848_v47 = vpop.f32.mrf.mxu0 }
 0x205   :  { %v892_v48 = vmul.f32 0.5, %v886_v44  ;;  %v888_v49 = vadd.f32 %v887_v46, %v847_v45  ;;  %v889_v50 = vpop.f32.mrf.mxu1 }
 0x206   :  { %v849_v51 = vpop.f32.mrf.mxu0 }
 0x207   :  { %1413 = vtanh.f32 %v892_v48  ;;  %v893_v52 = vmul.f32 0.5, %v888_v49  ;;  %v890_v53 = vpop.f32.mrf.mxu1 }
 0x209   :  { %1415 = vtanh.f32 %v893_v52 }
 0x214   :  { %v1414_v37 = vpop.eup %1413 }
 0x215   :  { %v896_v54 = vadd.f32 1.0, %v1414_v37 }
 0x216   :  { %v1416_v36 = vpop.eup %1415 }
 0x217   :  { %v898_v40 = vmul.f32 0.5, %v896_v54  ;;  %v897_v55 = vadd.f32 1.0, %v1416_v36 }
 0x219   :  { %v899_v56 = vmul.f32 0.5, %v897_v55  ;;  %v900_v57 = vmul.f32 %v898_v40, %v886_v44 }
 0x21b   :  { %v901_v58 = vmul.f32 %v899_v56, %v888_v49  ;;  %v902_v60 = vpack.c.bf16 %v900_v57, %v900_v57 }
 0x21d   :  { %v903_v59 = vpack.c.bf16 %v901_v58, %v901_v58 }
 0x21f   :  { %1071 = vmatprep.mubr.bf16.mxu0 %v903_v59 }
 0x220   :  { %1072 = vmatmul.mubr.bf16.vlgmr.msra.gmra.mxu0 %v902_v60 }
 0x2e0   :  { %v1226_v61 = vpop.f32.mrf.mxu0 }
 0x2e2   :  { %v1227_v63 = vpop.f32.mrf.mxu0 }
 0x2e3   :  { %v1228_v0 = vadd.f32 %v1227_v63, %v1226_v61 }
 0x2e4   :  { %v1229_v1 = vpop.f32.mrf.mxu0 }
 0x2e5   :  { %v1074_v2 = vadd.f32 %v1228_v0, %v1193_v62 }
 0x2e6   :  { %v1230_v3 = vpop.f32.mrf.mxu0 }
 0x2e7   :  { %1079 = vst [vmem:[#allocation11] sm:$0xff] %v1074_v2 }
 0x2e8   :  { %1528 = shalt.err (!%p1525_p1)
}
 0x2e9   :  { %1089 = dma.vmem_to_hbm [thread:$0]  %s1087_s8, 128, %s1643_s7, [#allocation4]  }
 0x2ea   :  { %1543 = dma.done.wait [#allocation4], 128  }
 0x2eb   :  { %1544 = vsyncadd [#allocation4], 4294967168 }
 0x2ec   :  { %1093 = vsyncpa [#allocation3], 1 }
 0x2ed   :  { %1094 = vsyncpa [#allocation6], 1 }
 0x2ee   :  { %1095 = vsyncpa [#allocation9], 1 }
 0x2ef   :  { %1096 = vsyncpa [#allocation4], 1 }

// kernel: tpu_custom_call.1
= control target key start
LH: loop header
LB: loop body
LE: loop exit
PB: predicated region body
PF: predicated region fallthrough
CT: control target
= control target key end

     0   :  { %12 = vsyncpa [#allocation3], 0  ;;  %s1636_s0 = inlined_call_operand.hbm [shape: f32[8,128], index: 0, kind: input, shape index: {}]   ;;  %s1637_s1 = inlined_call_operand.hbm [shape: bf16[128,512], index: 1, kind: input, shape index: {}]   ;;  %s1638_s2 = inlined_call_operand.hbm [shape: f32[1,512], index: 2, kind: input, shape index: {}]   ;;  %s1639_s3 = inlined_call_operand.hbm [shape: bf16[512,256], index: 3, kind: input, shape index: {}]   ;;  %s1640_s4 = inlined_call_operand.vmem [shape: f32[1,256], index: 4, kind: input, shape index: {}]   ;;  %s1641_s5 = inlined_call_operand.hbm [shape: bf16[256,128], index: 5, kind: input, shape index: {}]   ;;  %s1642_s6 = inlined_call_operand.vmem [shape: f32[1,128], index: 6, kind: input, shape index: {}]   ;;  %s1643_s7 = inlined_call_operand.hbm [shape: f32[8,128], index: 7, kind: output, shape index: {}]  }
   0x1   :  { %13 = vsyncpa [#allocation6], 0 }
   0x2   :  { %14 = vsyncpa [#allocation9], 0 }
   0x3   :  { %15 = vsyncpa [#allocation4], 0  ;;  %s1545_s24 = smov [#allocation5]  }
   0x4   :  { %s31_s25 = sshll.u32 %s1545_s24, 4  ;;  %s32_s25 = int_to_ptr.vmem [resolvable:$true] %s31_s25 }
   0x5   :  { %s1425_s26 = scalar_lea.vmem %s32_s25, 4096  ;;  %p1430_p1 = scmp.lt.s32.totalorder %s32_s25, %s32_s25 }
   0x6   :  { %p1426_p0 = scmp.ne.s32.totalorder %s32_s25, %s1425_s26  ;;  %p1431_p2 = scmp.lt.s32.totalorder %s1425_s26, %s1425_s26 }
   0x8   :  { %p1432_p3 = por %p1431_p2, %p1430_p1 }
   0xa   :  { %p1433_p4 = pnand %p1432_p3, %p1426_p0 }
   0xc   :  { %1436 = shalt.err (!%p1433_p4)
}
   0xd   :  { %s1546_s27 = smov 256   ;;  %s1547_s28 = smov 16  }
   0xe   :  { %37 = dma.hbm_to_vmem [thread:$0]  %s1637_s1, 4096, %s32_s25, [#allocation6], %s1546_s27, %s1546_s27, %s1547_s28  }
   0xf   :  { %s1548_s8 = smov [#allocation8]  }
  0x10   :  { %s53_s9 = sshll.u32 %s1548_s8, 4  ;;  %s54_s9 = int_to_ptr.vmem [resolvable:$true] %s53_s9 }
  0x11   :  { %s1445_s10 = scalar_lea.vmem %s54_s9, 8192  ;;  %p1450_p6 = scmp.lt.s32.totalorder %s54_s9, %s54_s9 }
  0x12   :  { %p1446_p5 = scmp.ne.s32.totalorder %s54_s9, %s1445_s10  ;;  %p1451_p7 = scmp.lt.s32.totalorder %s1445_s10, %s1445_s10 }
  0x14   :  { %p1452_p8 = por %p1451_p7, %p1450_p6 }
  0x16   :  { %p1453_p9 = pnand %p1452_p8, %p1446_p5 }
  0x18   :  { %1456 = shalt.err (!%p1453_p9)
}
  0x19   :  { %s1549_s11 = smov 128   ;;  %s1550_s12 = smov 8  }
  0x1a   :  { %59 = dma.hbm_to_vmem [thread:$0]  %s1639_s3, 8192, %s54_s9, [#allocation9], %s1549_s11, %s1549_s11, %s1550_s12  }
  0x1b   :  { %s1551_s15 = smov [#allocation2]   ;;  %s1552_s17 = smov [#allocation7]  }
  0x1c   :  { %s22_s16 = sshll.u32 %s1551_s15, 4  ;;  %s44_s1 = sshll.u32 %s1552_s17, 4  ;;  %s23_s16 = int_to_ptr.vmem [resolvable:$true] %s22_s16  ;;  %s45_s1 = int_to_ptr.vmem [resolvable:$true] %s44_s1 }
  0x1d   :  { %s1465_s18 = scalar_lea.vmem %s23_s16, 128  ;;  %p1470_p11 = scmp.lt.s32.totalorder %s23_s16, %s23_s16 }
  0x1e   :  { %p1466_p10 = scmp.ne.s32.totalorder %s23_s16, %s1465_s18  ;;  %p1471_p12 = scmp.lt.s32.totalorder %s1465_s18, %s1465_s18 }
  0x20   :  { %p1472_p13 = por %p1471_p12, %p1470_p11 }
  0x22   :  { %p1473_p0 = pnand %p1472_p13, %p1466_p10 }
  0x24   :  { %1476 = shalt.err (!%p1473_p0)
}
  0x25   :  { %25 = dma.hbm_to_vmem [thread:$0]  %s1636_s0, 128, %s23_s16, [#allocation3]  }
  0x26   :  { %s1485_s21 = scalar_lea.vmem %s45_s1, 64  ;;  %p1490_p2 = scmp.lt.s32.totalorder %s45_s1, %s45_s1 }
  0x27   :  { %p1486_p1 = scmp.ne.s32.totalorder %s45_s1, %s1485_s21  ;;  %p1491_p3 = scmp.lt.s32.totalorder %s1485_s21, %s1485_s21 }
  0x29   :  { %p1492_p4 = por %p1491_p3, %p1490_p2 }
  0x2b   :  { %p1493_p5 = pnand %p1492_p4, %p1486_p1 }
  0x2d   :  { %1496 = shalt.err (!%p1493_p5)
}
  0x2e   :  { %47 = dma.hbm_to_vmem [thread:$0]  %s1638_s2, 64, %s45_s1, [#allocation6]  }
  0x2f   :  { %s1553_s23 = smov [#allocation10]  }
  0x30   :  { %s67_s24 = sshll.u32 %s1553_s23, 4  ;;  %s68_s24 = int_to_ptr.vmem [resolvable:$true] %s67_s24 }
  0x31   :  { %s1505_s25 = scalar_lea.vmem %s68_s24, 2048  ;;  %p1510_p7 = scmp.lt.s32.totalorder %s68_s24, %s68_s24 }
  0x32   :  { %p1506_p6 = scmp.ne.s32.totalorder %s68_s24, %s1505_s25  ;;  %p1511_p8 = scmp.lt.s32.totalorder %s1505_s25, %s1505_s25 }
  0x34   :  { %p1512_p9 = por %p1511_p8, %p1510_p7 }
  0x36   :  { %p1513_p10 = pnand %p1512_p9, %p1506_p6 }
  0x38   :  { %1516 = shalt.err (!%p1513_p10)
}
  0x39   :  { %s1554_s0 = smov 64   ;;  %s1555_s26 = smov 4  }
  0x3a   :  { %73 = dma.hbm_to_vmem [thread:$0]  %s1641_s5, 2048, %s68_s24, [#allocation9], %s1554_s0, %s1554_s0, %s1555_s26  }
  0x3b   :  { %1537 = dma.done.wait [#allocation3], 128  }
  0x3c   :  { %1538 = vsyncadd [#allocation3], 4294967168 }
  0x3d   :  { %1539 = dma.done.wait [#allocation6], 4160  }
  0x3e   :  { %1540 = vsyncadd [#allocation6], 4294963136 }
  0x3f   :  { %1541 = dma.done.wait [#allocation9], 10240  }
  0x40   :  { %1542 = vsyncadd [#allocation9], 4294957056  ;;  %v1556_v0 = vmov 0   ;;  %v1245_v1 = vld [vmem:[#allocation5 + $0xe4] ss:$16 sps:$4 sm:$0xff]   ;;  %v92_v33 = vld [vmem:[#allocation2] sm:$0xff] }
  0x41   :  { %340 = vmatprep.mubr.bf16.mxu0 %v1556_v0  ;;  %381 = vmatprep.mubr.bf16.mxu1 %v1556_v0  ;;  %v1247_v2 = vld [vmem:[#allocation5 + $0xec] ss:$16 sps:$4 sm:$0xff]   ;;  %v1249_v3 = vld [vmem:[#allocation5 + $0xe0] ss:$16 sps:$4 sm:$0xff]   ;;  %v1250_v4 = vld [vmem:[#allocation5 + $0xe8] ss:$16 sps:$4 sm:$0xff]   ;;  %v93_v36 = vpack.c.bf16 %v92_v33, %v92_v33 }
  0x42   :  { %308 = vmatprep.subr.bf16.mxu0 %v1245_v1  ;;  %349 = vmatprep.subr.bf16.mxu1 %v1247_v2  ;;  %v1251_v5 = vld [vmem:[#allocation5 + $0xc4] ss:$16 sps:$4 sm:$0xff]   ;;  %v1253_v6 = vld [vmem:[#allocation5 + $0xcc] ss:$16 sps:$4 sm:$0xff]   ;;  %v1255_v7 = vld [vmem:[#allocation5 + $0xc0] ss:$16 sps:$4 sm:$0xff]  }
  0x43   :  { %309 = vmatpush1.bf16.msra.mxu0 %v1249_v3  ;;  %350 = vmatpush1.bf16.msra.mxu1 %v1250_v4  ;;  %v1256_v8 = vld [vmem:[#allocation5 + $0xc8] ss:$16 sps:$4 sm:$0xff]   ;;  %v1257_v9 = vld [vmem:[#allocation5 + $0xa4] ss:$16 sps:$4 sm:$0xff]   ;;  %v1259_v10 = vld [vmem:[#allocation5 + $0xac] ss:$16 sps:$4 sm:$0xff]  }
  0x44   :  { %310 = vmatprep.subr.bf16.mxu0 %v1251_v5  ;;  %351 = vmatprep.subr.bf16.mxu1 %v1253_v6  ;;  %v1261_v11 = vld [vmem:[#allocation5 + $0xa0] ss:$16 sps:$4 sm:$0xff]   ;;  %v1262_v12 = vld [vmem:[#allocation5 + $0xa8] ss:$16 sps:$4 sm:$0xff]   ;;  %v1263_v13 = vld [vmem:[#allocation5 + $0x84] ss:$16 sps:$4 sm:$0xff]  }
  0x45   :  { %v1265_v14 = vld [vmem:[#allocation5 + $0x8c] ss:$16 sps:$4 sm:$0xff]   ;;  %v1267_v15 = vld [vmem:[#allocation5 + $0x80] ss:$16 sps:$4 sm:$0xff]   ;;  %v1268_v16 = vld [vmem:[#allocation5 + $0x88] ss:$16 sps:$4 sm:$0xff]  }
  0x46   :  { %v1269_v17 = vld [vmem:[#allocation5 + $0x64] ss:$16 sps:$4 sm:$0xff]   ;;  %v1271_v18 = vld [vmem:[#allocation5 + $0x6c] ss:$16 sps:$4 sm:$0xff]   ;;  %v1273_v19 = vld [vmem:[#allocation5 + $0x60] ss:$16 sps:$4 sm:$0xff]  }
  0x47   :  { %311 = vmatpush1.bf16.msra.mxu0 %v1255_v7  ;;  %352 = vmatpush1.bf16.msra.mxu1 %v1256_v8  ;;  %v1274_v20 = vld [vmem:[#allocation5 + $0x68] ss:$16 sps:$4 sm:$0xff]   ;;  %v1275_v21 = vld [vmem:[#allocation5 + $0x44] ss:$16 sps:$4 sm:$0xff]   ;;  %v1277_v22 = vld [vmem:[#allocation5 + $0x4c] ss:$16 sps:$4 sm:$0xff]  }
  0x48   :  { %312 = vmatprep.subr.bf16.mxu0 %v1257_v9  ;;  %353 = vmatprep.subr.bf16.mxu1 %v1259_v10  ;;  %v1279_v23 = vld [vmem:[#allocation5 + $0x40] ss:$16 sps:$4 sm:$0xff]   ;;  %v1280_v24 = vld [vmem:[#allocation5 + $0x48] ss:$16 sps:$4 sm:$0xff]   ;;  %v1281_v25 = vld [vmem:[#allocation5 + $0x24] ss:$16 sps:$4 sm:$0xff]  }
  0x49   :  { %v1283_v26 = vld [vmem:[#allocation5 + $0x2c] ss:$16 sps:$4 sm:$0xff]   ;;  %v1285_v27 = vld [vmem:[#allocation5 + $0x20] ss:$16 sps:$4 sm:$0xff]   ;;  %v1286_v28 = vld [vmem:[#allocation5 + $0x28] ss:$16 sps:$4 sm:$0xff]  }
  0x4a   :  { %v1287_v29 = vld [vmem:[#allocation5 + $0x4] ss:$16 sps:$4 sm:$0xff]   ;;  %v1289_v30 = vld [vmem:[#allocation5 + $0xc] ss:$16 sps:$4 sm:$0xff]   ;;  %v1291_v31 = vld [vmem:[#allocation5] ss:$16 sps:$4 sm:$0xff]  }
  0x4b   :  { %313 = vmatpush1.bf16.msra.mxu0 %v1261_v11  ;;  %354 = vmatpush1.bf16.msra.mxu1 %v1262_v12  ;;  %v1292_v32 = vld [vmem:[#allocation5 + $0x8] ss:$16 sps:$4 sm:$0xff]   ;;  %v1293_v37 = vld [vmem:[#allocation8 + $0x70] ss:$8 sps:$4 sm:$0xff]   ;;  %v1299_v41 = vld [vmem:[#allocation8 + $0x60] ss:$8 sps:$4 sm:$0xff]  }
  0x4c   :  { %314 = vmatprep.subr.bf16.mxu0 %v1263_v13  ;;  %355 = vmatprep.subr.bf16.mxu1 %v1265_v14  ;;  %v1295_v34 = vld [vmem:[#allocation8 + $0x74] ss:$8 sps:$4 sm:$0xff]   ;;  %v1296_v38 = vld [vmem:[#allocation8 + $0x170] ss:$8 sps:$4 sm:$0xff]   ;;  %v1301_v39 = vld [vmem:[#allocation8 + $0x64] ss:$8 sps:$4 sm:$0xff]  }
  0x4d   :  { %v1298_v35 = vld [vmem:[#allocation8 + $0x174] ss:$8 sps:$4 sm:$0xff]   ;;  %v1304_v40 = vld [vmem:[#allocation8 + $0x164] ss:$8 sps:$4 sm:$0xff]   ;;  %v1302_v42 = vld [vmem:[#allocation8 + $0x160] ss:$8 sps:$4 sm:$0xff]  }
  0x4e   :  { %v1307_v43 = vld [vmem:[#allocation8 + $0x54] ss:$8 sps:$4 sm:$0xff]   ;;  %v1305_v45 = vld [vmem:[#allocation8 + $0x50] ss:$8 sps:$4 sm:$0xff]   ;;  %v1313_v47 = vld [vmem:[#allocation8 + $0x44] ss:$8 sps:$4 sm:$0xff]  }
  0x4f   :  { %315 = vmatpush1.bf16.msra.mxu0 %v1267_v15  ;;  %356 = vmatpush1.bf16.msra.mxu1 %v1268_v16  ;;  %v1310_v44 = vld [vmem:[#allocation8 + $0x154] ss:$8 sps:$4 sm:$0xff]   ;;  %v1308_v46 = vld [vmem:[#allocation8 + $0x150] ss:$8 sps:$4 sm:$0xff]   ;;  %v1316_v48 = vld [vmem:[#allocation8 + $0x144] ss:$8 sps:$4 sm:$0xff]  }
  0x50   :  { %316 = vmatprep.subr.bf16.mxu0 %v1269_v17  ;;  %357 = vmatprep.subr.bf16.mxu1 %v1271_v18  ;;  %v1311_v49 = vld [vmem:[#allocation8 + $0x40] ss:$8 sps:$4 sm:$0xff]   ;;  %v1319_v51 = vld [vmem:[#allocation8 + $0x34] ss:$8 sps:$4 sm:$0xff]   ;;  %v1317_v53 = vld [vmem:[#allocation8 + $0x30] ss:$8 sps:$4 sm:$0xff]  }
  0x51   :  { %v1314_v50 = vld [vmem:[#allocation8 + $0x140] ss:$8 sps:$4 sm:$0xff]   ;;  %v1322_v52 = vld [vmem:[#allocation8 + $0x134] ss:$8 sps:$4 sm:$0xff]   ;;  %v1320_v54 = vld [vmem:[#allocation8 + $0x130] ss:$8 sps:$4 sm:$0xff]  }
  0x52   :  { %v1325_v55 = vld [vmem:[#allocation8 + $0x24] ss:$8 sps:$4 sm:$0xff]   ;;  %v1323_v57 = vld [vmem:[#allocation8 + $0x20] ss:$8 sps:$4 sm:$0xff]   ;;  %v1331_v59 = vld [vmem:[#allocation8 + $0x14] ss:$8 sps:$4 sm:$0xff]  }
  0x53   :  { %317 = vmatpush1.bf16.msra.mxu0 %v1273_v19  ;;  %358 = vmatpush1.bf16.msra.mxu1 %v1274_v20  ;;  %v1328_v56 = vld [vmem:[#allocation8 + $0x124] ss:$8 sps:$4 sm:$0xff]   ;;  %v1326_v58 = vld [vmem:[#allocation8 + $0x120] ss:$8 sps:$4 sm:$0xff]   ;;  %v1334_v60 = vld [vmem:[#allocation8 + $0x114] ss:$8 sps:$4 sm:$0xff]  }
  0x54   :  { %318 = vmatprep.subr.bf16.mxu0 %v1275_v21  ;;  %359 = vmatprep.subr.bf16.mxu1 %v1277_v22  ;;  %v1329_v61 = vld [vmem:[#allocation8 + $0x10] ss:$8 sps:$4 sm:$0xff]   ;;  %v1337_v63 = vld [vmem:[#allocation8 + $0x4] ss:$8 sps:$4 sm:$0xff]   ;;  %v1335_v1 = vld [vmem:[#allocation8] ss:$8 sps:$4 sm:$0xff]  }
  0x55   :  { %v1332_v62 = vld [vmem:[#allocation8 + $0x110] ss:$8 sps:$4 sm:$0xff]   ;;  %v1340_v0 = vld [vmem:[#allocation8 + $0x104] ss:$8 sps:$4 sm:$0xff]   ;;  %v1338_v2 = vld [vmem:[#allocation8 + $0x100] ss:$8 sps:$4 sm:$0xff]  }
  0x56   :  { %v1343_v3 = vld [vmem:[#allocation8 + $0xf4] ss:$8 sps:$4 sm:$0xff]   ;;  %v1341_v5 = vld [vmem:[#allocation8 + $0xf0] ss:$8 sps:$4 sm:$0xff]   ;;  %v1349_v7 = vld [vmem:[#allocation8 + $0xe4] ss:$8 sps:$4 sm:$0xff]  }
  0x57   :  { %319 = vmatpush1.bf16.msra.mxu0 %v1279_v23  ;;  %360 = vmatpush1.bf16.msra.mxu1 %v1280_v24  ;;  %v1346_v4 = vld [vmem:[#allocation8 + $0x1f4] ss:$8 sps:$4 sm:$0xff]   ;;  %v1344_v6 = vld [vmem:[#allocation8 + $0x1f0] ss:$8 sps:$4 sm:$0xff]   ;;  %v1352_v8 = vld [vmem:[#allocation8 + $0x1e4] ss:$8 sps:$4 sm:$0xff]  }
  0x58   :  { %320 = vmatprep.subr.bf16.mxu0 %v1281_v25  ;;  %361 = vmatprep.subr.bf16.mxu1 %v1283_v26  ;;  %v1347_v9 = vld [vmem:[#allocation8 + $0xe0] ss:$8 sps:$4 sm:$0xff]   ;;  %v1355_v11 = vld [vmem:[#allocation8 + $0xd4] ss:$8 sps:$4 sm:$0xff]   ;;  %v1353_v13 = vld [vmem:[#allocation8 + $0xd0] ss:$8 sps:$4 sm:$0xff]  }
  0x59   :  { %v1350_v10 = vld [vmem:[#allocation8 + $0x1e0] ss:$8 sps:$4 sm:$0xff]   ;;  %v1358_v12 = vld [vmem:[#allocation8 + $0x1d4] ss:$8 sps:$4 sm:$0xff]   ;;  %v1356_v14 = vld [vmem:[#allocation8 + $0x1d0] ss:$8 sps:$4 sm:$0xff]  }
  0x5a   :  { %v1361_v15 = vld [vmem:[#allocation8 + $0xc4] ss:$8 sps:$4 sm:$0xff]   ;;  %v1359_v17 = vld [vmem:[#allocation8 + $0xc0] ss:$8 sps:$4 sm:$0xff]   ;;  %v1367_v19 = vld [vmem:[#allocation8 + $0xb4] ss:$8 sps:$4 sm:$0xff]  }
  0x5b   :  { %321 = vmatpush1.bf16.msra.mxu0 %v1285_v27  ;;  %362 = vmatpush1.bf16.msra.mxu1 %v1286_v28  ;;  %v1364_v16 = vld [vmem:[#allocation8 + $0x1c4] ss:$8 sps:$4 sm:$0xff]   ;;  %v1362_v18 = vld [vmem:[#allocation8 + $0x1c0] ss:$8 sps:$4 sm:$0xff]   ;;  %v1370_v20 = vld [vmem:[#allocation8 + $0x1b4] ss:$8 sps:$4 sm:$0xff]  }
  0x5c   :  { %322 = vmatprep.subr.bf16.mxu0 %v1287_v29  ;;  %363 = vmatprep.subr.bf16.mxu1 %v1289_v30  ;;  %v1365_v21 = vld [vmem:[#allocation8 + $0xb0] ss:$8 sps:$4 sm:$0xff]   ;;  %v1373_v23 = vld [vmem:[#allocation8 + $0xa4] ss:$8 sps:$4 sm:$0xff]   ;;  %v1371_v25 = vld [vmem:[#allocation8 + $0xa0] ss:$8 sps:$4 sm:$0xff]  }
  0x5d   :  { %v1368_v22 = vld [vmem:[#allocation8 + $0x1b0] ss:$8 sps:$4 sm:$0xff]   ;;  %v1376_v24 = vld [vmem:[#allocation8 + $0x1a4] ss:$8 sps:$4 sm:$0xff]   ;;  %v1374_v26 = vld [vmem:[#allocation8 + $0x1a0] ss:$8 sps:$4 sm:$0xff]  }
  0x5e   :  { %v1379_v27 = vld [vmem:[#allocation8 + $0x94] ss:$8 sps:$4 sm:$0xff]   ;;  %v1377_v29 = vld [vmem:[#allocation8 + $0x90] ss:$8 sps:$4 sm:$0xff]   ;;  %v1383_v33 = vld [vmem:[#allocation8 + $0x80] ss:$8 sps:$4 sm:$0xff]  }
  0x5f   :  { %323 = vmatpush1.bf16.msra.mxu0 %v1291_v31  ;;  %364 = vmatpush1.bf16.msra.mxu1 %v1292_v32  ;;  %v1382_v28 = vld [vmem:[#allocation8 + $0x194] ss:$8 sps:$4 sm:$0xff]   ;;  %v1380_v30 = vld [vmem:[#allocation8 + $0x190] ss:$8 sps:$4 sm:$0xff]   ;;  %v1385_v31 = vld [vmem:[#allocation8 + $0x84] ss:$8 sps:$4 sm:$0xff]  }
  0x60   :  { %810 = vmatprep.subr.bf16.mxu0 %v1295_v34  ;;  %851 = vmatprep.subr.bf16.mxu1 %v1298_v35  ;;  %v1388_v32 = vld [vmem:[#allocation8 + $0x184] ss:$8 sps:$4 sm:$0xff]   ;;  %v1386_v34 = vld [vmem:[#allocation8 + $0x180] ss:$8 sps:$4 sm:$0xff]   ;;  %v128_v35 = vlaneseq  ;;  %s1557_s30 = smov [#allocation11]  }
  0x61   :  { %s1086_s8 = sshll.u32 %s1557_s30, 4  ;;  %s1087_s8 = int_to_ptr.vmem [resolvable:$true] %s1086_s8 }
  0x62   :  { %341 = vmatmul.mubr.bf16.vlgmr.msra.gmra.mxu0 %v93_v36  ;;  %382 = vmatmul.mubr.bf16.vlgmr.msra.gmra.mxu1 %v93_v36  ;;  %v1613_v36 = vshrl.u32 %v128_v35, 7  ;;  %s1517_s9 = scalar_lea.vmem %s1087_s8, 128  ;;  %p1522_p12 = scmp.lt.s32.totalorder %s1087_s8, %s1087_s8 }
  0x63   :  { %811 = vmatpush1.bf16.msra.mxu0 %v1293_v37  ;;  %852 = vmatpush1.bf16.msra.mxu1 %v1296_v38  ;;  %p1518_p11 = scmp.ne.s32.totalorder %s1087_s8, %s1517_s9  ;;  %p1523_p13 = scmp.lt.s32.totalorder %s1517_s9, %s1517_s9 }
  0x64   :  { %812 = vmatprep.subr.bf16.mxu0 %v1301_v39  ;;  %853 = vmatprep.subr.bf16.mxu1 %v1304_v40  ;;  %v130_v37 = vsub.s32 0, %v1613_v36  ;;  %v138_v38 = vsub.s32 2, %v1613_v36  ;;  %v126_v39 = vld [vmem:[#allocation7] sm:$0xf]  ;;  %v134_v40 = vsub.s32 1, %v1613_v36 }
  0x65   :  { %p1524_p0 = por %p1523_p13, %p1522_p12 }
  0x67   :  { %813 = vmatpush1.bf16.msra.mxu0 %v1299_v41  ;;  %854 = vmatpush1.bf16.msra.mxu1 %v1302_v42  ;;  %v142_v41 = vsub.s32 3, %v1613_v36  ;;  %v131_v42 = vrot.slane %v126_v39, %v130_v37  ;;  %p1525_p1 = pnand %p1524_p0, %p1518_p11 }
  0x68   :  { %814 = vmatprep.subr.bf16.mxu0 %v1307_v43  ;;  %855 = vmatprep.subr.bf16.mxu1 %v1310_v44  ;;  %v139_v43 = vrot.slane %v126_v39, %v138_v38  ;;  %v135_v44 = vrot.slane %v126_v39, %v134_v40 }
  0x6b   :  { %815 = vmatpush1.bf16.msra.mxu0 %v1305_v45  ;;  %856 = vmatpush1.bf16.msra.mxu1 %v1308_v46  ;;  %v143_v45 = vrot.slane %v126_v39, %v142_v41 }
  0x6c   :  { %816 = vmatprep.subr.bf16.mxu0 %v1313_v47  ;;  %857 = vmatprep.subr.bf16.mxu1 %v1316_v48 }
  0x6f   :  { %817 = vmatpush1.bf16.msra.mxu0 %v1311_v49  ;;  %858 = vmatpush1.bf16.msra.mxu1 %v1314_v50 }
  0x70   :  { %818 = vmatprep.subr.bf16.mxu0 %v1319_v51  ;;  %859 = vmatprep.subr.bf16.mxu1 %v1322_v52 }
  0x73   :  { %819 = vmatpush1.bf16.msra.mxu0 %v1317_v53  ;;  %860 = vmatpush1.bf16.msra.mxu1 %v1320_v54 }
  0x74   :  { %820 = vmatprep.subr.bf16.mxu0 %v1325_v55  ;;  %861 = vmatprep.subr.bf16.mxu1 %v1328_v56 }
  0x77   :  { %821 = vmatpush1.bf16.msra.mxu0 %v1323_v57  ;;  %862 = vmatpush1.bf16.msra.mxu1 %v1326_v58 }
  0x78   :  { %822 = vmatprep.subr.bf16.mxu0 %v1331_v59  ;;  %863 = vmatprep.subr.bf16.mxu1 %v1334_v60 }
  0x7b   :  { %823 = vmatpush1.bf16.msra.mxu0 %v1329_v61  ;;  %864 = vmatpush1.bf16.msra.mxu1 %v1332_v62 }
  0x7c   :  { %824 = vmatprep.subr.bf16.mxu0 %v1337_v63  ;;  %865 = vmatprep.subr.bf16.mxu1 %v1340_v0 }
  0x7f   :  { %825 = vmatpush1.bf16.msra.mxu0 %v1335_v1  ;;  %866 = vmatpush1.bf16.msra.mxu1 %v1338_v2 }
  0x80   :  { %826 = vmatprep.subr.bf16.mxu0 %v1343_v3  ;;  %867 = vmatprep.subr.bf16.mxu1 %v1346_v4 }
  0x83   :  { %827 = vmatpush2.bf16.msra.mxu0 %v1341_v5  ;;  %868 = vmatpush2.bf16.msra.mxu1 %v1344_v6 }
  0x84   :  { %828 = vmatprep.subr.bf16.mxu0 %v1349_v7  ;;  %869 = vmatprep.subr.bf16.mxu1 %v1352_v8 }
  0x87   :  { %829 = vmatpush2.bf16.msra.mxu0 %v1347_v9  ;;  %870 = vmatpush2.bf16.msra.mxu1 %v1350_v10 }
  0x88   :  { %830 = vmatprep.subr.bf16.mxu0 %v1355_v11  ;;  %871 = vmatprep.subr.bf16.mxu1 %v1358_v12 }
  0x8b   :  { %831 = vmatpush2.bf16.msra.mxu0 %v1353_v13  ;;  %872 = vmatpush2.bf16.msra.mxu1 %v1356_v14 }
  0x8c   :  { %832 = vmatprep.subr.bf16.mxu0 %v1361_v15  ;;  %873 = vmatprep.subr.bf16.mxu1 %v1364_v16 }
  0x8f   :  { %833 = vmatpush2.bf16.msra.mxu0 %v1359_v17  ;;  %874 = vmatpush2.bf16.msra.mxu1 %v1362_v18  ;;  %v1389_v18 = vld [vmem:[#allocation10 + $0x78] sm:$0xff]  }
  0x90   :  { %834 = vmatprep.subr.bf16.mxu0 %v1367_v19  ;;  %875 = vmatprep.subr.bf16.mxu1 %v1370_v20  ;;  %v1390_v19 = vld [vmem:[#allocation10 + $0x38] sm:$0xff]   ;;  %v1391_v20 = vld [vmem:[#allocation10 + $0x70] sm:$0xff]  }
  0x93   :  { %835 = vmatpush2.bf16.msra.mxu0 %v1365_v21  ;;  %876 = vmatpush2.bf16.msra.mxu1 %v1368_v22  ;;  %v1392_v21 = vld [vmem:[#allocation10 + $0x30] sm:$0xff]   ;;  %v1393_v22 = vld [vmem:[#allocation10 + $0x68] sm:$0xff]  }
  0x94   :  { %836 = vmatprep.subr.bf16.mxu0 %v1373_v23  ;;  %877 = vmatprep.subr.bf16.mxu1 %v1376_v24  ;;  %v1394_v23 = vld [vmem:[#allocation10 + $0x28] sm:$0xff]   ;;  %v1395_v24 = vld [vmem:[#allocation10 + $0x60] sm:$0xff]  }
  0x97   :  { %837 = vmatpush2.bf16.msra.mxu0 %v1371_v25  ;;  %878 = vmatpush2.bf16.msra.mxu1 %v1374_v26  ;;  %v1396_v25 = vld [vmem:[#allocation10 + $0x20] sm:$0xff]   ;;  %v1397_v26 = vld [vmem:[#allocation10 + $0x58] sm:$0xff]  }
  0x98   :  { %838 = vmatprep.subr.bf16.mxu0 %v1379_v27  ;;  %879 = vmatprep.subr.bf16.mxu1 %v1382_v28  ;;  %v1398_v27 = vld [vmem:[#allocation10 + $0x18] sm:$0xff]   ;;  %v1399_v28 = vld [vmem:[#allocation10 + $0x50] sm:$0xff]  }
  0x9b   :  { %839 = vmatpush2.bf16.msra.mxu0 %v1377_v29  ;;  %880 = vmatpush2.bf16.msra.mxu1 %v1380_v30  ;;  %v1400_v29 = vld [vmem:[#allocation10 + $0x10] sm:$0xff]   ;;  %v1401_v30 = vld [vmem:[#allocation10 + $0x48] sm:$0xff]  }
  0x9c   :  { %840 = vmatprep.subr.bf16.mxu0 %v1385_v31  ;;  %881 = vmatprep.subr.bf16.mxu1 %v1388_v32  ;;  %v1402_v31 = vld [vmem:[#allocation10 + $0x8] sm:$0xff]   ;;  %v1403_v32 = vld [vmem:[#allocation10 + $0x40] sm:$0xff]  }
  0x9f   :  { %841 = vmatpush2.bf16.msra.mxu0 %v1383_v33  ;;  %882 = vmatpush2.bf16.msra.mxu1 %v1386_v34  ;;  %v1404_v33 = vld [vmem:[#allocation10] sm:$0xff]   ;;  %v478_v34 = vld [vmem:[%s1640_s4] sm:$0x3] }
  0xa0   :  { %1210 = vmatprep.subr.bf16.mxu0 %v1389_v18  ;;  %v483_v35 = vrot.slane %v478_v34, %v130_v37  ;;  %v487_v38 = vrot.slane %v478_v34, %v134_v40 }
 0x122   :  { %v342_v46 = vpop.f32.mrf.mxu0  ;;  %v383_v47 = vpop.f32.mrf.mxu1 }
 0x123   :  { %v343_v48 = vadd.f32 %v342_v46, %v131_v42  ;;  %v384_v49 = vadd.f32 %v383_v47, %v139_v43 }
 0x124   :  { %v344_v50 = vpop.f32.mrf.mxu0  ;;  %v385_v51 = vpop.f32.mrf.mxu1 }
 0x125   :  { %v390_v52 = vmul.f32 0.5, %v343_v48  ;;  %v392_v53 = vmul.f32 0.5, %v384_v49  ;;  %v345_v54 = vadd.f32 %v344_v50, %v135_v44  ;;  %v386_v55 = vadd.f32 %v385_v51, %v143_v45 }
 0x126   :  { %v346_v56 = vpop.f32.mrf.mxu0  ;;  %v387_v57 = vpop.f32.mrf.mxu1 }
 0x127   :  { %1405 = vtanh.f32 %v390_v52  ;;  %v391_v58 = vmul.f32 0.5, %v345_v54  ;;  %v393_v59 = vmul.f32 0.5, %v386_v55 }
 0x128   :  { %1407 = vtanh.f32 %v392_v53  ;;  %v347_v60 = vpop.f32.mrf.mxu0  ;;  %v388_v61 = vpop.f32.mrf.mxu1 }
 0x129   :  { %1409 = vtanh.f32 %v391_v58 }
 0x12a   :  { %1411 = vtanh.f32 %v393_v59 }
 0x134   :  { %v1406_v62 = vpop.eup %1405 }
 0x135   :  { %v1408_v63 = vpop.eup %1407  ;;  %v398_v0 = vadd.f32 1.0, %v1406_v62  ;;  %v1193_v62 = vld [vmem:[%s1642_s6] ss:$0 sm:$0xff] }
 0x136   :  { %v1410_v1 = vpop.eup %1409  ;;  %v400_v2 = vadd.f32 1.0, %v1408_v63 }
 0x137   :  { %v1412_v3 = vpop.eup %1411  ;;  %v402_v4 = vmul.f32 0.5, %v398_v0  ;;  %v399_v5 = vadd.f32 1.0, %v1410_v1 }
 0x138   :  { %v404_v6 = vmul.f32 0.5, %v400_v2  ;;  %v401_v7 = vadd.f32 1.0, %v1412_v3 }
 0x139   :  { %v403_v8 = vmul.f32 0.5, %v399_v5  ;;  %v406_v9 = vmul.f32 %v402_v4, %v343_v48 }
 0x13a   :  { %v405_v10 = vmul.f32 0.5, %v401_v7  ;;  %v408_v11 = vmul.f32 %v404_v6, %v384_v49 }
 0x13b   :  { %v407_v12 = vmul.f32 %v403_v8, %v345_v54  ;;  %v410_v15 = vpack.c.bf16 %v406_v9, %v406_v9 }
 0x13c   :  { %v409_v13 = vmul.f32 %v405_v10, %v386_v55  ;;  %v412_v17 = vpack.c.bf16 %v408_v11, %v408_v11 }
 0x13d   :  { %v411_v14 = vpack.c.bf16 %v407_v12, %v407_v12 }
 0x13e   :  { %v413_v16 = vpack.c.bf16 %v409_v13, %v409_v13 }
 0x13f   :  { %842 = vmatprep.mubr.bf16.mxu0 %v411_v14 }
 0x140   :  { %883 = vmatprep.mubr.bf16.mxu1 %v413_v16  ;;  %843 = vmatmul.mubr.bf16.vlgmr.msra.gmra.mxu0 %v410_v15 }
 0x141   :  { %884 = vmatmul.mubr.bf16.vlgmr.msra.gmra.mxu1 %v412_v17  ;;  %1211 = vmatpush3.bf16.msra.mxu0 %v1390_v19 }
 0x142   :  { %1212 = vmatprep.subr.bf16.mxu0 %v1391_v20 }
 0x145   :  { %1213 = vmatpush3.bf16.msra.mxu0 %v1392_v21 }
 0x146   :  { %1214 = vmatprep.subr.bf16.mxu0 %v1393_v22 }
 0x149   :  { %1215 = vmatpush3.bf16.msra.mxu0 %v1394_v23 }
 0x14a   :  { %1216 = vmatprep.subr.bf16.mxu0 %v1395_v24 }
 0x14d   :  { %1217 = vmatpush3.bf16.msra.mxu0 %v1396_v25 }
 0x14e   :  { %1218 = vmatprep.subr.bf16.mxu0 %v1397_v26 }
 0x151   :  { %1219 = vmatpush3.bf16.msra.mxu0 %v1398_v27 }
 0x152   :  { %1220 = vmatprep.subr.bf16.mxu0 %v1399_v28 }
 0x155   :  { %1221 = vmatpush3.bf16.msra.mxu0 %v1400_v29 }
 0x156   :  { %1222 = vmatprep.subr.bf16.mxu0 %v1401_v30 }
 0x159   :  { %1223 = vmatpush3.bf16.msra.mxu0 %v1402_v31 }
 0x15a   :  { %1224 = vmatprep.subr.bf16.mxu0 %v1403_v32 }
 0x15d   :  { %1225 = vmatpush3.bf16.msra.mxu0 %v1404_v33 }
 0x200   :  { %v844_v39 = vpop.f32.mrf.mxu0 }
 0x201   :  { %v845_v41 = vadd.f32 %v844_v39, %v483_v35  ;;  %v885_v42 = vpop.f32.mrf.mxu1 }
 0x202   :  { %v846_v43 = vpop.f32.mrf.mxu0 }
 0x203   :  { %v886_v44 = vadd.f32 %v885_v42, %v845_v41  ;;  %v847_v45 = vadd.f32 %v846_v43, %v487_v38  ;;  %v887_v46 = vpop.f32.mrf.mxu1 }
 0x204   :  { %v848_v47 = vpop.f32.mrf.mxu0 }
 0x205   :  { %v892_v48 = vmul.f32 0.5, %v886_v44  ;;  %v888_v49 = vadd.f32 %v887_v46, %v847_v45  ;;  %v889_v50 = vpop.f32.mrf.mxu1 }
 0x206   :  { %v849_v51 = vpop.f32.mrf.mxu0 }
 0x207   :  { %1413 = vtanh.f32 %v892_v48  ;;  %v893_v52 = vmul.f32 0.5, %v888_v49  ;;  %v890_v53 = vpop.f32.mrf.mxu1 }
 0x209   :  { %1415 = vtanh.f32 %v893_v52 }
 0x214   :  { %v1414_v37 = vpop.eup %1413 }
 0x215   :  { %v896_v54 = vadd.f32 1.0, %v1414_v37 }
 0x216   :  { %v1416_v36 = vpop.eup %1415 }
 0x217   :  { %v898_v40 = vmul.f32 0.5, %v896_v54  ;;  %v897_v55 = vadd.f32 1.0, %v1416_v36 }
 0x219   :  { %v899_v56 = vmul.f32 0.5, %v897_v55  ;;  %v900_v57 = vmul.f32 %v898_v40, %v886_v44 }
 0x21b   :  { %v901_v58 = vmul.f32 %v899_v56, %v888_v49  ;;  %v902_v60 = vpack.c.bf16 %v900_v57, %v900_v57 }
 0x21d   :  { %v903_v59 = vpack.c.bf16 %v901_v58, %v901_v58 }
 0x21f   :  { %1071 = vmatprep.mubr.bf16.mxu0 %v903_v59 }
 0x220   :  { %1072 = vmatmul.mubr.bf16.vlgmr.msra.gmra.mxu0 %v902_v60 }
 0x2e0   :  { %v1226_v61 = vpop.f32.mrf.mxu0 }
 0x2e2   :  { %v1227_v63 = vpop.f32.mrf.mxu0 }
 0x2e3   :  { %v1228_v0 = vadd.f32 %v1227_v63, %v1226_v61 }
 0x2e4   :  { %v1229_v1 = vpop.f32.mrf.mxu0 }
 0x2e5   :  { %v1074_v2 = vadd.f32 %v1228_v0, %v1193_v62 }
 0x2e6   :  { %v1230_v3 = vpop.f32.mrf.mxu0 }
 0x2e7   :  { %1079 = vst [vmem:[#allocation11] sm:$0xff] %v1074_v2 }
 0x2e8   :  { %1528 = shalt.err (!%p1525_p1)
}
 0x2e9   :  { %1089 = dma.vmem_to_hbm [thread:$0]  %s1087_s8, 128, %s1643_s7, [#allocation4]  }
 0x2ea   :  { %1543 = dma.done.wait [#allocation4], 128  }
 0x2eb   :  { %1544 = vsyncadd [#allocation4], 4294967168 }
 0x2ec   :  { %1093 = vsyncpa [#allocation3], 1 }
 0x2ed   :  { %1094 = vsyncpa [#allocation6], 1 }
 0x2ee   :  { %1095 = vsyncpa [#allocation9], 1 }
 0x2ef   :  { %1096 = vsyncpa [#allocation4], 1 }

</bundles_post_ra>
